<compile_context>
chip_gen: v7x
topology: tpu7x:2x2x1
jax: 0.10.0
libtpu: 0.0.40
codegen_flags: <defaults>
</compile_context>

<pallas_src>
import jax
import jax.numpy as jnp
from jax.experimental import pallas as pl
from jax.experimental.pallas import tpu as pltpu


def _round_up(x, m):
    return ((x + m - 1) // m) * m


def _choose_tile(batch, batch_tile):
    """Batch tile: multiple of 16 (bf16 sublanes), >=2 grid steps if possible."""
    full = _round_up(batch, 16)
    if full <= 16:
        return 16
    # Half-batch cap -> at least two "parallel" grid steps (v7x megacore) and
    # less padded waste than one full-batch tile.
    half = _round_up(pl.cdiv(full, 2), 16)
    return max(16, min(batch_tile, half))


def _autoencoder_kernel(x_ref, *refs):
    """Fused 8-layer MLP autoencoder on one (TM, input_size) batch tile.

    refs = (w1, b1, w2, b2, ..., w8, b8, out_ref).
    Layers 0-6 use ReLU except layer 3 (bottleneck, no activation, matching
    nn.Sequential(..., Linear(hidden_3, bottle_neck))); layer 7 ends with Tanh.
    """
    out_ref = refs[-1]
    param_refs = refs[:-1]
    num_layers = len(param_refs) // 2  # 8

    # f32 tile straight from HBM; bf16 cast happens on the VPU (free filler).
    h = x_ref[...].astype(jnp.bfloat16)                  # (TM, 784)
    for layer in range(num_layers):
        w = param_refs[2 * layer][...]                   # bf16 (in_p, out_p)
        b = param_refs[2 * layer + 1][...]               # f32  (1, out_p)
        # bf16 operands, f32 accumulation on the MXU; elementwise stays f32.
        h = jnp.dot(h, w, preferred_element_type=jnp.float32) + b
        if layer == num_layers - 1:
            h = jnp.tanh(h)                              # decoder's final Tanh
        else:
            if layer != 3:
                h = jnp.maximum(h, 0.0)                  # ReLU(inplace=True)
            h = h.astype(jnp.bfloat16)                   # re-quantize for next dot
    out_ref[...] = h.astype(out_ref.dtype)


def _build_inputs(tm, input_size, pdims, params, buffered_params):
    """Padded bf16 weights / f32 biases + their (VMEM-resident) BlockSpecs."""
    param_kwargs = {}
    if buffered_params:
        # Constant index_map -> params never change; a single buffer suffices.
        param_kwargs = dict(pipeline_mode=pl.Buffered(1))

    in_specs = [pl.BlockSpec((tm, input_size), lambda i: (i, 0))]
    flat_params = []
    for li, (w, b) in enumerate(params):
        din, dout = w.shape
        pin, pout = pdims[li], pdims[li + 1]
        # Zero padding => ReLU(0)=0 and zero rows of the next layer contribute
        # nothing, so valid outputs are unchanged.
        w_p = jnp.zeros((pin, pout), jnp.bfloat16).at[:din, :dout].set(
            w.astype(jnp.bfloat16))
        b_p = jnp.zeros((1, pout), jnp.float32).at[:, :dout].set(
            b.astype(jnp.float32).reshape(1, dout))
        flat_params.append(w_p)
        flat_params.append(b_p)
        in_specs.append(pl.BlockSpec((pin, pout), lambda i: (0, 0), **param_kwargs))
        in_specs.append(pl.BlockSpec((1, pout), lambda i: (0, 0), **param_kwargs))
    return flat_params, in_specs


def autoencoder_forward(x, params, *, batch_tile=512, lane_pad=128,
                        out_dtype=jnp.bfloat16):
    """x: (batch, input_size) float32. params: list of (W, b), W is (in, out)."""
    batch, input_size = x.shape
    assert input_size == 784, "final view((-1, 1, 28, 28)) requires input_size == 784"
    x = x.astype(jnp.float32)

    tm = _choose_tile(batch, batch_tile)
    padded_batch = _round_up(batch, tm)
    if padded_batch != batch:
        # Padded rows are garbage but are sliced off below; they feed nothing.
        x = jnp.pad(x, ((0, padded_batch - batch), (0, 0)))

    # Zero-pad hidden feature dims up to lane_pad (=128) multiples so every
    # activation fills whole vregs.  Keep 128 (not 256): kernel is HBM-bound.
    dims = [w.shape[0] for (w, _) in params] + [params[-1][0].shape[1]]
    pdims = [dims[0]] + [_round_up(d, lane_pad) for d in dims[1:-1]] + [dims[-1]]

    def run(buffered_params):
        flat_params, in_specs = _build_inputs(tm, input_size, pdims, params,
                                              buffered_params)
        call = pl.pallas_call(
            _autoencoder_kernel,
            out_shape=jax.ShapeDtypeStruct((padded_batch, input_size), out_dtype),
            grid=(padded_batch // tm,),
            in_specs=in_specs,
            out_specs=pl.BlockSpec((tm, input_size), lambda i: (i, 0)),
            compiler_params=pltpu.CompilerParams(
                dimension_semantics=("parallel",)),
        )
        return call(x, *flat_params)

    try:
        out_flat = run(buffered_params=True)
    except Exception:
        # Older/newer Pallas may reject Buffered(1); default buffering is safe.
        out_flat = run(buffered_params=False)

    out_flat = out_flat[:batch]
    # Matches `x.view((-1, 1, 28, 28))`.
    return out_flat.reshape((-1, 1, 28, 28))


def init_params(key, dims):
    """PyTorch-style default init: U(-1/sqrt(fan_in), 1/sqrt(fan_in))."""
    params = []
    for d_in, d_out in zip(dims[:-1], dims[1:]):
        key, kw, kb = jax.random.split(key, 3)
        bound = 1.0 / jnp.sqrt(jnp.float32(d_in))
        w = jax.random.uniform(kw, (d_in, d_out), jnp.float32, -bound, bound)
        b = jax.random.uniform(kb, (1, d_out), jnp.float32, -bound, bound)
        params.append((w, b))
    return params


if __name__ == "__main__":
    # The final view((-1, 1, 28, 28)) pins input_size to 784.
    input_size, hidden_1, hidden_2, hidden_3, bottle_neck = 784, 128, 64, 32, 16
    batch = 2

    key = jax.random.PRNGKey(0)
    key, kx = jax.random.split(key)
    x = jax.random.normal(kx, (batch, input_size), dtype=jnp.float32)

    # encode: 784 -> 128 -> 64 -> 32 -> 16 ; decode: 16 -> 32 -> 64 -> 128 -> 784
    dims = [input_size, hidden_1, hidden_2, hidden_3, bottle_neck,
            hidden_3, hidden_2, hidden_1, input_size]
    params = init_params(key, dims)

    out = autoencoder_forward(x, params)
    out = jax.block_until_ready(out)

    # Reference in plain JAX using the same bf16 quantization of dot operands
    # (bf16 x bf16 products are exact in f32, so this matches the MXU path).
    h = x.astype(jnp.bfloat16).astype(jnp.float32)
    for i, (w, b) in enumerate(params):
        wq = w.astype(jnp.bfloat16).astype(jnp.float32)
        hq = h.astype(jnp.bfloat16).astype(jnp.float32)
        h = jnp.dot(hq, wq, preferred_element_type=jnp.float32) + b
        if i == len(params) - 1:
            h = jnp.tanh(h)
        elif i != 3:
            h = jnp.maximum(h, 0.0)
    ref = h.reshape((-1, 1, 28, 28))

    assert out.shape == (batch, 1, 28, 28), out.shape
    # Tolerance covers the bf16 output rounding (~4e-3 abs near tanh = +/-1).
    err = jnp.max(jnp.abs(out.astype(jnp.float32) - ref))
    assert jnp.allclose(out.astype(jnp.float32), ref, atol=8e-3, rtol=8e-3), float(err)
    print("KERNEL_OK")
</pallas_src>

<mosaic_0001>
module attributes {stable_mosaic.version = 11 : i64} {
  func.func @_autoencoder_kernel(%arg0: i32, %arg1: memref<16x784xf32, #tpu.memory_space<vmem>>, %arg2: memref<784x128xbf16, #tpu.memory_space<vmem>>, %arg3: memref<1x128xf32, #tpu.memory_space<vmem>>, %arg4: memref<128x128xbf16, #tpu.memory_space<vmem>>, %arg5: memref<1x128xf32, #tpu.memory_space<vmem>>, %arg6: memref<128x128xbf16, #tpu.memory_space<vmem>>, %arg7: memref<1x128xf32, #tpu.memory_space<vmem>>, %arg8: memref<128x128xbf16, #tpu.memory_space<vmem>>, %arg9: memref<1x128xf32, #tpu.memory_space<vmem>>, %arg10: memref<128x128xbf16, #tpu.memory_space<vmem>>, %arg11: memref<1x128xf32, #tpu.memory_space<vmem>>, %arg12: memref<128x128xbf16, #tpu.memory_space<vmem>>, %arg13: memref<1x128xf32, #tpu.memory_space<vmem>>, %arg14: memref<128x128xbf16, #tpu.memory_space<vmem>>, %arg15: memref<1x128xf32, #tpu.memory_space<vmem>>, %arg16: memref<128x784xbf16, #tpu.memory_space<vmem>>, %arg17: memref<1x784xf32, #tpu.memory_space<vmem>>, %arg18: memref<16x784xbf16, #tpu.memory_space<vmem>>) attributes {dimension_semantics = [#tpu.dimension_semantics<parallel>], iteration_bounds = array<i64: 1>, scalar_prefetch = 0 : i64, scratch_operands = 0 : i64, tpu.core_type = #tpu.core_type<tc>, window_params = [{transform_indices = @transform_0, window_bounds = array<i64: 16, 784>}, {pipeline_mode = #tpu.pipeline_mode<synchronous>, transform_indices = @transform_1, window_bounds = array<i64: 784, 128>}, {pipeline_mode = #tpu.pipeline_mode<synchronous>, transform_indices = @transform_2, window_bounds = array<i64: 1, 128>}, {pipeline_mode = #tpu.pipeline_mode<synchronous>, transform_indices = @transform_3, window_bounds = array<i64: 128, 128>}, {pipeline_mode = #tpu.pipeline_mode<synchronous>, transform_indices = @transform_4, window_bounds = array<i64: 1, 128>}, {pipeline_mode = #tpu.pipeline_mode<synchronous>, transform_indices = @transform_5, window_bounds = array<i64: 128, 128>}, {pipeline_mode = #tpu.pipeline_mode<synchronous>, transform_indices = @transform_6, window_bounds = array<i64: 1, 128>}, {pipeline_mode = #tpu.pipeline_mode<synchronous>, transform_indices = @transform_7, window_bounds = array<i64: 128, 128>}, {pipeline_mode = #tpu.pipeline_mode<synchronous>, transform_indices = @transform_8, window_bounds = array<i64: 1, 128>}, {pipeline_mode = #tpu.pipeline_mode<synchronous>, transform_indices = @transform_9, window_bounds = array<i64: 128, 128>}, {pipeline_mode = #tpu.pipeline_mode<synchronous>, transform_indices = @transform_10, window_bounds = array<i64: 1, 128>}, {pipeline_mode = #tpu.pipeline_mode<synchronous>, transform_indices = @transform_11, window_bounds = array<i64: 128, 128>}, {pipeline_mode = #tpu.pipeline_mode<synchronous>, transform_indices = @transform_12, window_bounds = array<i64: 1, 128>}, {pipeline_mode = #tpu.pipeline_mode<synchronous>, transform_indices = @transform_13, window_bounds = array<i64: 128, 128>}, {pipeline_mode = #tpu.pipeline_mode<synchronous>, transform_indices = @transform_14, window_bounds = array<i64: 1, 128>}, {pipeline_mode = #tpu.pipeline_mode<synchronous>, transform_indices = @transform_15, window_bounds = array<i64: 128, 784>}, {pipeline_mode = #tpu.pipeline_mode<synchronous>, transform_indices = @transform_16, window_bounds = array<i64: 1, 784>}, {transform_indices = @transform_17, window_bounds = array<i64: 16, 784>}]} {
    %c0 = arith.constant 0 : index
    %c0_0 = arith.constant 0 : index
    %0 = vector.load %arg1[%c0, %c0_0] : memref<16x784xf32, #tpu.memory_space<vmem>>, vector<16x784xf32>
    %1 = arith.truncf %0 : vector<16x784xf32> to vector<16x784xbf16>
    %c0_1 = arith.constant 0 : index
    %c0_2 = arith.constant 0 : index
    %2 = vector.load %arg2[%c0_1, %c0_2] : memref<784x128xbf16, #tpu.memory_space<vmem>>, vector<784x128xbf16>
    %c0_3 = arith.constant 0 : index
    %c0_4 = arith.constant 0 : index
    %3 = vector.load %arg3[%c0_3, %c0_4] : memref<1x128xf32, #tpu.memory_space<vmem>>, vector<1x128xf32>
    %cst = arith.constant dense<0.000000e+00> : vector<16x128xf32>
    %4 = tpu.matmul %1, %2, %cst {dimension_numbers = #tpu.dot_dimension_numbers<[1], [0], [0], [1], [0, 0, 1, 1], [], []>} : vector<16x784xbf16>, vector<784x128xbf16>, vector<16x128xf32> -> vector<16x128xf32>
    %5 = vector.broadcast %3 : vector<1x128xf32> to vector<16x128xf32>
    %6 = arith.addf %4, %5 : vector<16x128xf32>
    %cst_5 = arith.constant 0.000000e+00 : f32
    %7 = vector.broadcast %cst_5 : f32 to vector<16x128xf32>
    %8 = arith.maximumf %6, %7 : vector<16x128xf32>
    %9 = arith.truncf %8 : vector<16x128xf32> to vector<16x128xbf16>
    %c0_6 = arith.constant 0 : index
    %c0_7 = arith.constant 0 : index
    %10 = vector.load %arg4[%c0_6, %c0_7] : memref<128x128xbf16, #tpu.memory_space<vmem>>, vector<128x128xbf16>
    %c0_8 = arith.constant 0 : index
    %c0_9 = arith.constant 0 : index
    %11 = vector.load %arg5[%c0_8, %c0_9] : memref<1x128xf32, #tpu.memory_space<vmem>>, vector<1x128xf32>
    %cst_10 = arith.constant dense<0.000000e+00> : vector<16x128xf32>
    %12 = tpu.matmul %9, %10, %cst_10 {dimension_numbers = #tpu.dot_dimension_numbers<[1], [0], [0], [1], [0, 0, 1, 1], [], []>} : vector<16x128xbf16>, vector<128x128xbf16>, vector<16x128xf32> -> vector<16x128xf32>
    %13 = vector.broadcast %11 : vector<1x128xf32> to vector<16x128xf32>
    %14 = arith.addf %12, %13 : vector<16x128xf32>
    %cst_11 = arith.constant 0.000000e+00 : f32
    %15 = vector.broadcast %cst_11 : f32 to vector<16x128xf32>
    %16 = arith.maximumf %14, %15 : vector<16x128xf32>
    %17 = arith.truncf %16 : vector<16x128xf32> to vector<16x128xbf16>
    %c0_12 = arith.constant 0 : index
    %c0_13 = arith.constant 0 : index
    %18 = vector.load %arg6[%c0_12, %c0_13] : memref<128x128xbf16, #tpu.memory_space<vmem>>, vector<128x128xbf16>
    %c0_14 = arith.constant 0 : index
    %c0_15 = arith.constant 0 : index
    %19 = vector.load %arg7[%c0_14, %c0_15] : memref<1x128xf32, #tpu.memory_space<vmem>>, vector<1x128xf32>
    %cst_16 = arith.constant dense<0.000000e+00> : vector<16x128xf32>
    %20 = tpu.matmul %17, %18, %cst_16 {dimension_numbers = #tpu.dot_dimension_numbers<[1], [0], [0], [1], [0, 0, 1, 1], [], []>} : vector<16x128xbf16>, vector<128x128xbf16>, vector<16x128xf32> -> vector<16x128xf32>
    %21 = vector.broadcast %19 : vector<1x128xf32> to vector<16x128xf32>
    %22 = arith.addf %20, %21 : vector<16x128xf32>
    %cst_17 = arith.constant 0.000000e+00 : f32
    %23 = vector.broadcast %cst_17 : f32 to vector<16x128xf32>
    %24 = arith.maximumf %22, %23 : vector<16x128xf32>
    %25 = arith.truncf %24 : vector<16x128xf32> to vector<16x128xbf16>
    %c0_18 = arith.constant 0 : index
    %c0_19 = arith.constant 0 : index
    %26 = vector.load %arg8[%c0_18, %c0_19] : memref<128x128xbf16, #tpu.memory_space<vmem>>, vector<128x128xbf16>
    %c0_20 = arith.constant 0 : index
    %c0_21 = arith.constant 0 : index
    %27 = vector.load %arg9[%c0_20, %c0_21] : memref<1x128xf32, #tpu.memory_space<vmem>>, vector<1x128xf32>
    %cst_22 = arith.constant dense<0.000000e+00> : vector<16x128xf32>
    %28 = tpu.matmul %25, %26, %cst_22 {dimension_numbers = #tpu.dot_dimension_numbers<[1], [0], [0], [1], [0, 0, 1, 1], [], []>} : vector<16x128xbf16>, vector<128x128xbf16>, vector<16x128xf32> -> vector<16x128xf32>
    %29 = vector.broadcast %27 : vector<1x128xf32> to vector<16x128xf32>
    %30 = arith.addf %28, %29 : vector<16x128xf32>
    %31 = arith.truncf %30 : vector<16x128xf32> to vector<16x128xbf16>
    %c0_23 = arith.constant 0 : index
    %c0_24 = arith.constant 0 : index
    %32 = vector.load %arg10[%c0_23, %c0_24] : memref<128x128xbf16, #tpu.memory_space<vmem>>, vector<128x128xbf16>
    %c0_25 = arith.constant 0 : index
    %c0_26 = arith.constant 0 : index
    %33 = vector.load %arg11[%c0_25, %c0_26] : memref<1x128xf32, #tpu.memory_space<vmem>>, vector<1x128xf32>
    %cst_27 = arith.constant dense<0.000000e+00> : vector<16x128xf32>
    %34 = tpu.matmul %31, %32, %cst_27 {dimension_numbers = #tpu.dot_dimension_numbers<[1], [0], [0], [1], [0, 0, 1, 1], [], []>} : vector<16x128xbf16>, vector<128x128xbf16>, vector<16x128xf32> -> vector<16x128xf32>
    %35 = vector.broadcast %33 : vector<1x128xf32> to vector<16x128xf32>
    %36 = arith.addf %34, %35 : vector<16x128xf32>
    %cst_28 = arith.constant 0.000000e+00 : f32
    %37 = vector.broadcast %cst_28 : f32 to vector<16x128xf32>
    %38 = arith.maximumf %36, %37 : vector<16x128xf32>
    %39 = arith.truncf %38 : vector<16x128xf32> to vector<16x128xbf16>
    %c0_29 = arith.constant 0 : index
    %c0_30 = arith.constant 0 : index
    %40 = vector.load %arg12[%c0_29, %c0_30] : memref<128x128xbf16, #tpu.memory_space<vmem>>, vector<128x128xbf16>
    %c0_31 = arith.constant 0 : index
    %c0_32 = arith.constant 0 : index
    %41 = vector.load %arg13[%c0_31, %c0_32] : memref<1x128xf32, #tpu.memory_space<vmem>>, vector<1x128xf32>
    %cst_33 = arith.constant dense<0.000000e+00> : vector<16x128xf32>
    %42 = tpu.matmul %39, %40, %cst_33 {dimension_numbers = #tpu.dot_dimension_numbers<[1], [0], [0], [1], [0, 0, 1, 1], [], []>} : vector<16x128xbf16>, vector<128x128xbf16>, vector<16x128xf32> -> vector<16x128xf32>
    %43 = vector.broadcast %41 : vector<1x128xf32> to vector<16x128xf32>
    %44 = arith.addf %42, %43 : vector<16x128xf32>
    %cst_34 = arith.constant 0.000000e+00 : f32
    %45 = vector.broadcast %cst_34 : f32 to vector<16x128xf32>
    %46 = arith.maximumf %44, %45 : vector<16x128xf32>
    %47 = arith.truncf %46 : vector<16x128xf32> to vector<16x128xbf16>
    %c0_35 = arith.constant 0 : index
    %c0_36 = arith.constant 0 : index
    %48 = vector.load %arg14[%c0_35, %c0_36] : memref<128x128xbf16, #tpu.memory_space<vmem>>, vector<128x128xbf16>
    %c0_37 = arith.constant 0 : index
    %c0_38 = arith.constant 0 : index
    %49 = vector.load %arg15[%c0_37, %c0_38] : memref<1x128xf32, #tpu.memory_space<vmem>>, vector<1x128xf32>
    %cst_39 = arith.constant dense<0.000000e+00> : vector<16x128xf32>
    %50 = tpu.matmul %47, %48, %cst_39 {dimension_numbers = #tpu.dot_dimension_numbers<[1], [0], [0], [1], [0, 0, 1, 1], [], []>} : vector<16x128xbf16>, vector<128x128xbf16>, vector<16x128xf32> -> vector<16x128xf32>
    %51 = vector.broadcast %49 : vector<1x128xf32> to vector<16x128xf32>
    %52 = arith.addf %50, %51 : vector<16x128xf32>
    %cst_40 = arith.constant 0.000000e+00 : f32
    %53 = vector.broadcast %cst_40 : f32 to vector<16x128xf32>
    %54 = arith.maximumf %52, %53 : vector<16x128xf32>
    %55 = arith.truncf %54 : vector<16x128xf32> to vector<16x128xbf16>
    %c0_41 = arith.constant 0 : index
    %c0_42 = arith.constant 0 : index
    %56 = vector.load %arg16[%c0_41, %c0_42] : memref<128x784xbf16, #tpu.memory_space<vmem>>, vector<128x784xbf16>
    %c0_43 = arith.constant 0 : index
    %c0_44 = arith.constant 0 : index
    %57 = vector.load %arg17[%c0_43, %c0_44] : memref<1x784xf32, #tpu.memory_space<vmem>>, vector<1x784xf32>
    %cst_45 = arith.constant dense<0.000000e+00> : vector<16x784xf32>
    %58 = tpu.matmul %55, %56, %cst_45 {dimension_numbers = #tpu.dot_dimension_numbers<[1], [0], [0], [1], [0, 0, 1, 1], [], []>} : vector<16x128xbf16>, vector<128x784xbf16>, vector<16x784xf32> -> vector<16x784xf32>
    %59 = vector.broadcast %57 : vector<1x784xf32> to vector<16x784xf32>
    %60 = arith.addf %58, %59 : vector<16x784xf32>
    %61 = math.tanh %60 : vector<16x784xf32>
    %62 = arith.truncf %61 : vector<16x784xf32> to vector<16x784xbf16>
    %c0_46 = arith.constant 0 : index
    %c0_47 = arith.constant 0 : index
    %63 = vector.load %arg18[%c0_46, %c0_47] : memref<16x784xbf16, #tpu.memory_space<vmem>>, vector<16x784xbf16>
    tpu.vector_store %arg18[%c0_46, %c0_47], %62 {strides = array<i32>} : memref<16x784xbf16, #tpu.memory_space<vmem>>, vector<16x784xbf16>,
    return
  }
  func.func @transform_0(%arg0: i32) -> (i32, i32) {
    %c0_i32 = arith.constant 0 : i32
    %c0_i32_0 = arith.constant 0 : i32
    return %arg0, %c0_i32 : i32, i32
  }
  func.func @transform_1(%arg0: i32) -> (i32, i32) {
    %c0_i32 = arith.constant 0 : i32
    %c0_i32_0 = arith.constant 0 : i32
    %c0_i32_1 = arith.constant 0 : i32
    return %c0_i32, %c0_i32_0 : i32, i32
  }
  func.func @transform_2(%arg0: i32) -> (i32, i32) {
    %c0_i32 = arith.constant 0 : i32
    %c0_i32_0 = arith.constant 0 : i32
    %c0_i32_1 = arith.constant 0 : i32
    return %c0_i32, %c0_i32_0 : i32, i32
  }
  func.func @transform_3(%arg0: i32) -> (i32, i32) {
    %c0_i32 = arith.constant 0 : i32
    %c0_i32_0 = arith.constant 0 : i32
    %c0_i32_1 = arith.constant 0 : i32
    return %c0_i32, %c0_i32_0 : i32, i32
  }
  func.func @transform_4(%arg0: i32) -> (i32, i32) {
    %c0_i32 = arith.constant 0 : i32
    %c0_i32_0 = arith.constant 0 : i32
    %c0_i32_1 = arith.constant 0 : i32
    return %c0_i32, %c0_i32_0 : i32, i32
  }
  func.func @transform_5(%arg0: i32) -> (i32, i32) {
    %c0_i32 = arith.constant 0 : i32
    %c0_i32_0 = arith.constant 0 : i32
    %c0_i32_1 = arith.constant 0 : i32
    return %c0_i32, %c0_i32_0 : i32, i32
  }
  func.func @transform_6(%arg0: i32) -> (i32, i32) {
    %c0_i32 = arith.constant 0 : i32
    %c0_i32_0 = arith.constant 0 : i32
    %c0_i32_1 = arith.constant 0 : i32
    return %c0_i32, %c0_i32_0 : i32, i32
  }
  func.func @transform_7(%arg0: i32) -> (i32, i32) {
    %c0_i32 = arith.constant 0 : i32
    %c0_i32_0 = arith.constant 0 : i32
    %c0_i32_1 = arith.constant 0 : i32
    return %c0_i32, %c0_i32_0 : i32, i32
  }
  func.func @transform_8(%arg0: i32) -> (i32, i32) {
    %c0_i32 = arith.constant 0 : i32
    %c0_i32_0 = arith.constant 0 : i32
    %c0_i32_1 = arith.constant 0 : i32
    return %c0_i32, %c0_i32_0 : i32, i32
  }
  func.func @transform_9(%arg0: i32) -> (i32, i32) {
    %c0_i32 = arith.constant 0 : i32
    %c0_i32_0 = arith.constant 0 : i32
    %c0_i32_1 = arith.constant 0 : i32
    return %c0_i32, %c0_i32_0 : i32, i32
  }
  func.func @transform_10(%arg0: i32) -> (i32, i32) {
    %c0_i32 = arith.constant 0 : i32
    %c0_i32_0 = arith.constant 0 : i32
    %c0_i32_1 = arith.constant 0 : i32
    return %c0_i32, %c0_i32_0 : i32, i32
  }
  func.func @transform_11(%arg0: i32) -> (i32, i32) {
    %c0_i32 = arith.constant 0 : i32
    %c0_i32_0 = arith.constant 0 : i32
    %c0_i32_1 = arith.constant 0 : i32
    return %c0_i32, %c0_i32_0 : i32, i32
  }
  func.func @transform_12(%arg0: i32) -> (i32, i32) {
    %c0_i32 = arith.constant 0 : i32
    %c0_i32_0 = arith.constant 0 : i32
    %c0_i32_1 = arith.constant 0 : i32
    return %c0_i32, %c0_i32_0 : i32, i32
  }
  func.func @transform_13(%arg0: i32) -> (i32, i32) {
    %c0_i32 = arith.constant 0 : i32
    %c0_i32_0 = arith.constant 0 : i32
    %c0_i32_1 = arith.constant 0 : i32
    return %c0_i32, %c0_i32_0 : i32, i32
  }
  func.func @transform_14(%arg0: i32) -> (i32, i32) {
    %c0_i32 = arith.constant 0 : i32
    %c0_i32_0 = arith.constant 0 : i32
    %c0_i32_1 = arith.constant 0 : i32
    return %c0_i32, %c0_i32_0 : i32, i32
  }
  func.func @transform_15(%arg0: i32) -> (i32, i32) {
    %c0_i32 = arith.constant 0 : i32
    %c0_i32_0 = arith.constant 0 : i32
    %c0_i32_1 = arith.constant 0 : i32
    return %c0_i32, %c0_i32_0 : i32, i32
  }
  func.func @transform_16(%arg0: i32) -> (i32, i32) {
    %c0_i32 = arith.constant 0 : i32
    %c0_i32_0 = arith.constant 0 : i32
    %c0_i32_1 = arith.constant 0 : i32
    return %c0_i32, %c0_i32_0 : i32, i32
  }
  func.func @transform_17(%arg0: i32) -> (i32, i32) {
    %c0_i32 = arith.constant 0 : i32
    %c0_i32_0 = arith.constant 0 : i32
    return %arg0, %c0_i32 : i32, i32
  }
}

module attributes {stable_mosaic.version = 11 : i64} {
  func.func @_autoencoder_kernel(%arg0: i32, %arg1: memref<16x784xf32, #tpu.memory_space<vmem>>, %arg2: memref<784x128xbf16, #tpu.memory_space<vmem>>, %arg3: memref<1x128xf32, #tpu.memory_space<vmem>>, %arg4: memref<128x128xbf16, #tpu.memory_space<vmem>>, %arg5: memref<1x128xf32, #tpu.memory_space<vmem>>, %arg6: memref<128x128xbf16, #tpu.memory_space<vmem>>, %arg7: memref<1x128xf32, #tpu.memory_space<vmem>>, %arg8: memref<128x128xbf16, #tpu.memory_space<vmem>>, %arg9: memref<1x128xf32, #tpu.memory_space<vmem>>, %arg10: memref<128x128xbf16, #tpu.memory_space<vmem>>, %arg11: memref<1x128xf32, #tpu.memory_space<vmem>>, %arg12: memref<128x128xbf16, #tpu.memory_space<vmem>>, %arg13: memref<1x128xf32, #tpu.memory_space<vmem>>, %arg14: memref<128x128xbf16, #tpu.memory_space<vmem>>, %arg15: memref<1x128xf32, #tpu.memory_space<vmem>>, %arg16: memref<128x784xbf16, #tpu.memory_space<vmem>>, %arg17: memref<1x784xf32, #tpu.memory_space<vmem>>, %arg18: memref<16x784xbf16, #tpu.memory_space<vmem>>) attributes {dimension_semantics = [#tpu.dimension_semantics<parallel>], iteration_bounds = array<i64: 1>, scalar_prefetch = 0 : i64, scratch_operands = 0 : i64, tpu.core_type = #tpu.core_type<tc>, window_params = [{transform_indices = @transform_0, window_bounds = array<i64: 16, 784>}, {pipeline_mode = #tpu.pipeline_mode<synchronous>, transform_indices = @transform_1, window_bounds = array<i64: 784, 128>}, {pipeline_mode = #tpu.pipeline_mode<synchronous>, transform_indices = @transform_2, window_bounds = array<i64: 1, 128>}, {pipeline_mode = #tpu.pipeline_mode<synchronous>, transform_indices = @transform_3, window_bounds = array<i64: 128, 128>}, {pipeline_mode = #tpu.pipeline_mode<synchronous>, transform_indices = @transform_4, window_bounds = array<i64: 1, 128>}, {pipeline_mode = #tpu.pipeline_mode<synchronous>, transform_indices = @transform_5, window_bounds = array<i64: 128, 128>}, {pipeline_mode = #tpu.pipeline_mode<synchronous>, transform_indices = @transform_6, window_bounds = array<i64: 1, 128>}, {pipeline_mode = #tpu.pipeline_mode<synchronous>, transform_indices = @transform_7, window_bounds = array<i64: 128, 128>}, {pipeline_mode = #tpu.pipeline_mode<synchronous>, transform_indices = @transform_8, window_bounds = array<i64: 1, 128>}, {pipeline_mode = #tpu.pipeline_mode<synchronous>, transform_indices = @transform_9, window_bounds = array<i64: 128, 128>}, {pipeline_mode = #tpu.pipeline_mode<synchronous>, transform_indices = @transform_10, window_bounds = array<i64: 1, 128>}, {pipeline_mode = #tpu.pipeline_mode<synchronous>, transform_indices = @transform_11, window_bounds = array<i64: 128, 128>}, {pipeline_mode = #tpu.pipeline_mode<synchronous>, transform_indices = @transform_12, window_bounds = array<i64: 1, 128>}, {pipeline_mode = #tpu.pipeline_mode<synchronous>, transform_indices = @transform_13, window_bounds = array<i64: 128, 128>}, {pipeline_mode = #tpu.pipeline_mode<synchronous>, transform_indices = @transform_14, window_bounds = array<i64: 1, 128>}, {pipeline_mode = #tpu.pipeline_mode<synchronous>, transform_indices = @transform_15, window_bounds = array<i64: 128, 784>}, {pipeline_mode = #tpu.pipeline_mode<synchronous>, transform_indices = @transform_16, window_bounds = array<i64: 1, 784>}, {transform_indices = @transform_17, window_bounds = array<i64: 16, 784>}]} {
    %c0 = arith.constant 0 : index
    %c0_0 = arith.constant 0 : index
    %0 = vector.load %arg1[%c0, %c0_0] : memref<16x784xf32, #tpu.memory_space<vmem>>, vector<16x784xf32>
    %1 = arith.truncf %0 : vector<16x784xf32> to vector<16x784xbf16>
    %c0_1 = arith.constant 0 : index
    %c0_2 = arith.constant 0 : index
    %2 = vector.load %arg2[%c0_1, %c0_2] : memref<784x128xbf16, #tpu.memory_space<vmem>>, vector<784x128xbf16>
    %c0_3 = arith.constant 0 : index
    %c0_4 = arith.constant 0 : index
    %3 = vector.load %arg3[%c0_3, %c0_4] : memref<1x128xf32, #tpu.memory_space<vmem>>, vector<1x128xf32>
    %cst = arith.constant dense<0.000000e+00> : vector<16x128xf32>
    %4 = tpu.matmul %1, %2, %cst {dimension_numbers = #tpu.dot_dimension_numbers<[1], [0], [0], [1], [0, 0, 1, 1], [], []>} : vector<16x784xbf16>, vector<784x128xbf16>, vector<16x128xf32> -> vector<16x128xf32>
    %5 = vector.broadcast %3 : vector<1x128xf32> to vector<16x128xf32>
    %6 = arith.addf %4, %5 : vector<16x128xf32>
    %cst_5 = arith.constant 0.000000e+00 : f32
    %7 = vector.broadcast %cst_5 : f32 to vector<16x128xf32>
    %8 = arith.maximumf %6, %7 : vector<16x128xf32>
    %9 = arith.truncf %8 : vector<16x128xf32> to vector<16x128xbf16>
    %c0_6 = arith.constant 0 : index
    %c0_7 = arith.constant 0 : index
    %10 = vector.load %arg4[%c0_6, %c0_7] : memref<128x128xbf16, #tpu.memory_space<vmem>>, vector<128x128xbf16>
    %c0_8 = arith.constant 0 : index
    %c0_9 = arith.constant 0 : index
    %11 = vector.load %arg5[%c0_8, %c0_9] : memref<1x128xf32, #tpu.memory_space<vmem>>, vector<1x128xf32>
    %cst_10 = arith.constant dense<0.000000e+00> : vector<16x128xf32>
    %12 = tpu.matmul %9, %10, %cst_10 {dimension_numbers = #tpu.dot_dimension_numbers<[1], [0], [0], [1], [0, 0, 1, 1], [], []>} : vector<16x128xbf16>, vector<128x128xbf16>, vector<16x128xf32> -> vector<16x128xf32>
    %13 = vector.broadcast %11 : vector<1x128xf32> to vector<16x128xf32>
    %14 = arith.addf %12, %13 : vector<16x128xf32>
    %cst_11 = arith.constant 0.000000e+00 : f32
    %15 = vector.broadcast %cst_11 : f32 to vector<16x128xf32>
    %16 = arith.maximumf %14, %15 : vector<16x128xf32>
    %17 = arith.truncf %16 : vector<16x128xf32> to vector<16x128xbf16>
    %c0_12 = arith.constant 0 : index
    %c0_13 = arith.constant 0 : index
    %18 = vector.load %arg6[%c0_12, %c0_13] : memref<128x128xbf16, #tpu.memory_space<vmem>>, vector<128x128xbf16>
    %c0_14 = arith.constant 0 : index
    %c0_15 = arith.constant 0 : index
    %19 = vector.load %arg7[%c0_14, %c0_15] : memref<1x128xf32, #tpu.memory_space<vmem>>, vector<1x128xf32>
    %cst_16 = arith.constant dense<0.000000e+00> : vector<16x128xf32>
    %20 = tpu.matmul %17, %18, %cst_16 {dimension_numbers = #tpu.dot_dimension_numbers<[1], [0], [0], [1], [0, 0, 1, 1], [], []>} : vector<16x128xbf16>, vector<128x128xbf16>, vector<16x128xf32> -> vector<16x128xf32>
    %21 = vector.broadcast %19 : vector<1x128xf32> to vector<16x128xf32>
    %22 = arith.addf %20, %21 : vector<16x128xf32>
    %cst_17 = arith.constant 0.000000e+00 : f32
    %23 = vector.broadcast %cst_17 : f32 to vector<16x128xf32>
    %24 = arith.maximumf %22, %23 : vector<16x128xf32>
    %25 = arith.truncf %24 : vector<16x128xf32> to vector<16x128xbf16>
    %c0_18 = arith.constant 0 : index
    %c0_19 = arith.constant 0 : index
    %26 = vector.load %arg8[%c0_18, %c0_19] : memref<128x128xbf16, #tpu.memory_space<vmem>>, vector<128x128xbf16>
    %c0_20 = arith.constant 0 : index
    %c0_21 = arith.constant 0 : index
    %27 = vector.load %arg9[%c0_20, %c0_21] : memref<1x128xf32, #tpu.memory_space<vmem>>, vector<1x128xf32>
    %cst_22 = arith.constant dense<0.000000e+00> : vector<16x128xf32>
    %28 = tpu.matmul %25, %26, %cst_22 {dimension_numbers = #tpu.dot_dimension_numbers<[1], [0], [0], [1], [0, 0, 1, 1], [], []>} : vector<16x128xbf16>, vector<128x128xbf16>, vector<16x128xf32> -> vector<16x128xf32>
    %29 = vector.broadcast %27 : vector<1x128xf32> to vector<16x128xf32>
    %30 = arith.addf %28, %29 : vector<16x128xf32>
    %31 = arith.truncf %30 : vector<16x128xf32> to vector<16x128xbf16>
    %c0_23 = arith.constant 0 : index
    %c0_24 = arith.constant 0 : index
    %32 = vector.load %arg10[%c0_23, %c0_24] : memref<128x128xbf16, #tpu.memory_space<vmem>>, vector<128x128xbf16>
    %c0_25 = arith.constant 0 : index
    %c0_26 = arith.constant 0 : index
    %33 = vector.load %arg11[%c0_25, %c0_26] : memref<1x128xf32, #tpu.memory_space<vmem>>, vector<1x128xf32>
    %cst_27 = arith.constant dense<0.000000e+00> : vector<16x128xf32>
    %34 = tpu.matmul %31, %32, %cst_27 {dimension_numbers = #tpu.dot_dimension_numbers<[1], [0], [0], [1], [0, 0, 1, 1], [], []>} : vector<16x128xbf16>, vector<128x128xbf16>, vector<16x128xf32> -> vector<16x128xf32>
    %35 = vector.broadcast %33 : vector<1x128xf32> to vector<16x128xf32>
    %36 = arith.addf %34, %35 : vector<16x128xf32>
    %cst_28 = arith.constant 0.000000e+00 : f32
    %37 = vector.broadcast %cst_28 : f32 to vector<16x128xf32>
    %38 = arith.maximumf %36, %37 : vector<16x128xf32>
    %39 = arith.truncf %38 : vector<16x128xf32> to vector<16x128xbf16>
    %c0_29 = arith.constant 0 : index
    %c0_30 = arith.constant 0 : index
    %40 = vector.load %arg12[%c0_29, %c0_30] : memref<128x128xbf16, #tpu.memory_space<vmem>>, vector<128x128xbf16>
    %c0_31 = arith.constant 0 : index
    %c0_32 = arith.constant 0 : index
    %41 = vector.load %arg13[%c0_31, %c0_32] : memref<1x128xf32, #tpu.memory_space<vmem>>, vector<1x128xf32>
    %cst_33 = arith.constant dense<0.000000e+00> : vector<16x128xf32>
    %42 = tpu.matmul %39, %40, %cst_33 {dimension_numbers = #tpu.dot_dimension_numbers<[1], [0], [0], [1], [0, 0, 1, 1], [], []>} : vector<16x128xbf16>, vector<128x128xbf16>, vector<16x128xf32> -> vector<16x128xf32>
    %43 = vector.broadcast %41 : vector<1x128xf32> to vector<16x128xf32>
    %44 = arith.addf %42, %43 : vector<16x128xf32>
    %cst_34 = arith.constant 0.000000e+00 : f32
    %45 = vector.broadcast %cst_34 : f32 to vector<16x128xf32>
    %46 = arith.maximumf %44, %45 : vector<16x128xf32>
    %47 = arith.truncf %46 : vector<16x128xf32> to vector<16x128xbf16>
    %c0_35 = arith.constant 0 : index
    %c0_36 = arith.constant 0 : index
    %48 = vector.load %arg14[%c0_35, %c0_36] : memref<128x128xbf16, #tpu.memory_space<vmem>>, vector<128x128xbf16>
    %c0_37 = arith.constant 0 : index
    %c0_38 = arith.constant 0 : index
    %49 = vector.load %arg15[%c0_37, %c0_38] : memref<1x128xf32, #tpu.memory_space<vmem>>, vector<1x128xf32>
    %cst_39 = arith.constant dense<0.000000e+00> : vector<16x128xf32>
    %50 = tpu.matmul %47, %48, %cst_39 {dimension_numbers = #tpu.dot_dimension_numbers<[1], [0], [0], [1], [0, 0, 1, 1], [], []>} : vector<16x128xbf16>, vector<128x128xbf16>, vector<16x128xf32> -> vector<16x128xf32>
    %51 = vector.broadcast %49 : vector<1x128xf32> to vector<16x128xf32>
    %52 = arith.addf %50, %51 : vector<16x128xf32>
    %cst_40 = arith.constant 0.000000e+00 : f32
    %53 = vector.broadcast %cst_40 : f32 to vector<16x128xf32>
    %54 = arith.maximumf %52, %53 : vector<16x128xf32>
    %55 = arith.truncf %54 : vector<16x128xf32> to vector<16x128xbf16>
    %c0_41 = arith.constant 0 : index
    %c0_42 = arith.constant 0 : index
    %56 = vector.load %arg16[%c0_41, %c0_42] : memref<128x784xbf16, #tpu.memory_space<vmem>>, vector<128x784xbf16>
    %c0_43 = arith.constant 0 : index
    %c0_44 = arith.constant 0 : index
    %57 = vector.load %arg17[%c0_43, %c0_44] : memref<1x784xf32, #tpu.memory_space<vmem>>, vector<1x784xf32>
    %cst_45 = arith.constant dense<0.000000e+00> : vector<16x784xf32>
    %58 = tpu.matmul %55, %56, %cst_45 {dimension_numbers = #tpu.dot_dimension_numbers<[1], [0], [0], [1], [0, 0, 1, 1], [], []>} : vector<16x128xbf16>, vector<128x784xbf16>, vector<16x784xf32> -> vector<16x784xf32>
    %59 = vector.broadcast %57 : vector<1x784xf32> to vector<16x784xf32>
    %60 = arith.addf %58, %59 : vector<16x784xf32>
    %61 = math.tanh %60 : vector<16x784xf32>
    %62 = arith.truncf %61 : vector<16x784xf32> to vector<16x784xbf16>
    %c0_46 = arith.constant 0 : index
    %c0_47 = arith.constant 0 : index
    %63 = vector.load %arg18[%c0_46, %c0_47] : memref<16x784xbf16, #tpu.memory_space<vmem>>, vector<16x784xbf16>
    tpu.vector_store %arg18[%c0_46, %c0_47], %62 {strides = array<i32>} : memref<16x784xbf16, #tpu.memory_space<vmem>>, vector<16x784xbf16>,
    return
  }
  func.func @transform_0(%arg0: i32) -> (i32, i32) {
    %c0_i32 = arith.constant 0 : i32
    %c0_i32_0 = arith.constant 0 : i32
    return %arg0, %c0_i32 : i32, i32
  }
  func.func @transform_1(%arg0: i32) -> (i32, i32) {
    %c0_i32 = arith.constant 0 : i32
    %c0_i32_0 = arith.constant 0 : i32
    %c0_i32_1 = arith.constant 0 : i32
    return %c0_i32, %c0_i32_0 : i32, i32
  }
  func.func @transform_2(%arg0: i32) -> (i32, i32) {
    %c0_i32 = arith.constant 0 : i32
    %c0_i32_0 = arith.constant 0 : i32
    %c0_i32_1 = arith.constant 0 : i32
    return %c0_i32, %c0_i32_0 : i32, i32
  }
  func.func @transform_3(%arg0: i32) -> (i32, i32) {
    %c0_i32 = arith.constant 0 : i32
    %c0_i32_0 = arith.constant 0 : i32
    %c0_i32_1 = arith.constant 0 : i32
    return %c0_i32, %c0_i32_0 : i32, i32
  }
  func.func @transform_4(%arg0: i32) -> (i32, i32) {
    %c0_i32 = arith.constant 0 : i32
    %c0_i32_0 = arith.constant 0 : i32
    %c0_i32_1 = arith.constant 0 : i32
    return %c0_i32, %c0_i32_0 : i32, i32
  }
  func.func @transform_5(%arg0: i32) -> (i32, i32) {
    %c0_i32 = arith.constant 0 : i32
    %c0_i32_0 = arith.constant 0 : i32
    %c0_i32_1 = arith.constant 0 : i32
    return %c0_i32, %c0_i32_0 : i32, i32
  }
  func.func @transform_6(%arg0: i32) -> (i32, i32) {
    %c0_i32 = arith.constant 0 : i32
    %c0_i32_0 = arith.constant 0 : i32
    %c0_i32_1 = arith.constant 0 : i32
    return %c0_i32, %c0_i32_0 : i32, i32
  }
  func.func @transform_7(%arg0: i32) -> (i32, i32) {
    %c0_i32 = arith.constant 0 : i32
    %c0_i32_0 = arith.constant 0 : i32
    %c0_i32_1 = arith.constant 0 : i32
    return %c0_i32, %c0_i32_0 : i32, i32
  }
  func.func @transform_8(%arg0: i32) -> (i32, i32) {
    %c0_i32 = arith.constant 0 : i32
    %c0_i32_0 = arith.constant 0 : i32
    %c0_i32_1 = arith.constant 0 : i32
    return %c0_i32, %c0_i32_0 : i32, i32
  }
  func.func @transform_9(%arg0: i32) -> (i32, i32) {
    %c0_i32 = arith.constant 0 : i32
    %c0_i32_0 = arith.constant 0 : i32
    %c0_i32_1 = arith.constant 0 : i32
    return %c0_i32, %c0_i32_0 : i32, i32
  }
  func.func @transform_10(%arg0: i32) -> (i32, i32) {
    %c0_i32 = arith.constant 0 : i32
    %c0_i32_0 = arith.constant 0 : i32
    %c0_i32_1 = arith.constant 0 : i32
    return %c0_i32, %c0_i32_0 : i32, i32
  }
  func.func @transform_11(%arg0: i32) -> (i32, i32) {
    %c0_i32 = arith.constant 0 : i32
    %c0_i32_0 = arith.constant 0 : i32
    %c0_i32_1 = arith.constant 0 : i32
    return %c0_i32, %c0_i32_0 : i32, i32
  }
  func.func @transform_12(%arg0: i32) -> (i32, i32) {
    %c0_i32 = arith.constant 0 : i32
    %c0_i32_0 = arith.constant 0 : i32
    %c0_i32_1 = arith.constant 0 : i32
    return %c0_i32, %c0_i32_0 : i32, i32
  }
  func.func @transform_13(%arg0: i32) -> (i32, i32) {
    %c0_i32 = arith.constant 0 : i32
    %c0_i32_0 = arith.constant 0 : i32
    %c0_i32_1 = arith.constant 0 : i32
    return %c0_i32, %c0_i32_0 : i32, i32
  }
  func.func @transform_14(%arg0: i32) -> (i32, i32) {
    %c0_i32 = arith.constant 0 : i32
    %c0_i32_0 = arith.constant 0 : i32
    %c0_i32_1 = arith.constant 0 : i32
    return %c0_i32, %c0_i32_0 : i32, i32
  }
  func.func @transform_15(%arg0: i32) -> (i32, i32) {
    %c0_i32 = arith.constant 0 : i32
    %c0_i32_0 = arith.constant 0 : i32
    %c0_i32_1 = arith.constant 0 : i32
    return %c0_i32, %c0_i32_0 : i32, i32
  }
  func.func @transform_16(%arg0: i32) -> (i32, i32) {
    %c0_i32 = arith.constant 0 : i32
    %c0_i32_0 = arith.constant 0 : i32
    %c0_i32_1 = arith.constant 0 : i32
    return %c0_i32, %c0_i32_0 : i32, i32
  }
  func.func @transform_17(%arg0: i32) -> (i32, i32) {
    %c0_i32 = arith.constant 0 : i32
    %c0_i32_0 = arith.constant 0 : i32
    return %arg0, %c0_i32 : i32, i32
  }
}

</mosaic_0001>

<bundles_post_ra>
// kernel: tpu_custom_call.1
= control target key start
LH: loop header
LB: loop body
LE: loop exit
PB: predicated region body
PF: predicated region fallthrough
CT: control target
= control target key end

     0   :  { %s3407_s0 = inlined_call_operand.vmem [shape: f32[16,784], index: 0, kind: input, shape index: {}]   ;;  %s3408_s1 = inlined_call_operand.vmem [shape: bf16[784,128], index: 1, kind: input, shape index: {}]   ;;  %s3409_s2 = inlined_call_operand.vmem [shape: f32[1,128], index: 2, kind: input, shape index: {}]   ;;  %s3410_s3 = inlined_call_operand.vmem [shape: bf16[128,128], index: 3, kind: input, shape index: {}]   ;;  %s3411_s4 = inlined_call_operand.vmem [shape: f32[1,128], index: 4, kind: input, shape index: {}]   ;;  %s3412_s5 = inlined_call_operand.vmem [shape: bf16[128,128], index: 5, kind: input, shape index: {}]   ;;  %s3413_s6 = inlined_call_operand.vmem [shape: f32[1,128], index: 6, kind: input, shape index: {}]   ;;  %s3414_s7 = inlined_call_operand.vmem [shape: bf16[128,128], index: 7, kind: input, shape index: {}]   ;;  %s3415_s8 = inlined_call_operand.vmem [shape: f32[1,128], index: 8, kind: input, shape index: {}]   ;;  %s3416_s9 = inlined_call_operand.vmem [shape: bf16[128,128], index: 9, kind: input, shape index: {}]   ;;  %s3417_s10 = inlined_call_operand.vmem [shape: f32[1,128], index: 10, kind: input, shape index: {}]   ;;  %s3418_s11 = inlined_call_operand.vmem [shape: bf16[128,128], index: 11, kind: input, shape index: {}]   ;;  %s3419_s12 = inlined_call_operand.vmem [shape: f32[1,128], index: 12, kind: input, shape index: {}]   ;;  %s3420_s13 = inlined_call_operand.hbm [shape: bf16[128,128], index: 13, kind: input, shape index: {}]   ;;  %s3421_s14 = inlined_call_operand.vmem [shape: f32[1,128], index: 14, kind: input, shape index: {}]   ;;  %s3422_s15 = inlined_call_operand.vmem [shape: bf16[128,784], index: 15, kind: input, shape index: {}]   ;;  %s3423_s16 = inlined_call_operand.vmem [shape: f32[1,784], index: 16, kind: input, shape index: {}]   ;;  %s3424_s17 = inlined_call_operand.hbm [shape: bf16[16,784], index: 17, kind: output, shape index: {}]  }
   0x1   :  { %3427 = sst [smem:[#allocation8_spill]] %s3407_s0 }
   0x2   :  { %3428 = sst [smem:[#allocation9_spill]] %s3408_s1 }
   0x3   :  { %22 = vsyncpa [#allocation3], 0 }
   0x4   :  { %23 = vsyncpa [#allocation4], 0  ;;  %s2710_s24 = smov [#allocation2]   ;;  %s2662_s28 = scalar_lea.hbm %s3420_s13, 1024 }
   0x5   :  { %s55_s25 = sshll.u32 %s2710_s24, 4  ;;  %p2663_p0 = scmp.ne.s32.totalorder %s3420_s13, %s2662_s28  ;;  %s56_s25 = int_to_ptr.vmem [resolvable:$true] %s55_s25 }
   0x6   :  { %p2666_p1 = scmp.lt.u32.totalorder %s2662_s28, %s3420_s13 }
   0x8   :  { %p2668_p2 = pnand %p2666_p1, %p2663_p0 }
   0xa   :  { %2671 = shalt.err (!%p2668_p2)
}
   0xb   :  { %s2672_s19 = scalar_lea.vmem %s56_s25, 1024  ;;  %p2677_p4 = scmp.lt.s32.totalorder %s56_s25, %s56_s25 }
   0xc   :  { %p2673_p3 = scmp.ne.s32.totalorder %s56_s25, %s2672_s19  ;;  %p2678_p5 = scmp.lt.s32.totalorder %s2672_s19, %s2672_s19 }
   0xe   :  { %p2679_p6 = por %p2678_p5, %p2677_p4 }
  0x10   :  { %p2680_p7 = pnand %p2679_p6, %p2673_p3 }
  0x12   :  { %2683 = shalt.err (!%p2680_p7)
}
  0x13   :  { %s2711_s1 = smov 64   ;;  %s2712_s20 = smov 4  }
  0x14   :  { %61 = dma.hbm_to_vmem [thread:$0]  %s3420_s13, 1024, %s56_s25, [#allocation3], %s2711_s1, %s2711_s1, %s2712_s20  }
  0x15   :  { %2706 = dma.done.wait [#allocation3], 1024  }
  0x16   :  { %2707 = vsyncadd [#allocation3], 4294966272  ;;  %s3429_s26 = sld [smem:[#allocation9_spill]]  ;;  %s3430_s29 = sld [smem:[#allocation8_spill]]  ;;  %v2713_v43 = vmov 0.0   ;;  %vm2714_vm0 = vmmov 0  }
  0x17   :  { %vm492_vm1 = vcmask 130048   ;;  %vm1971_vm2 = vcmask 125952  }
  0x1c   :  { %v2457_v0 = vld [vmem:[%s3429_s26 + $0x40] sm:$0xff]   ;;  %v2461_v4 = vld [vmem:[%s3429_s26 + $0x48] sm:$0xff]   ;;  %v2465_v8 = vld [vmem:[%s3429_s26 + $0x50] sm:$0xff]  }
  0x1d   :  { %v2458_v1 = vld [vmem:[%s3429_s26] sm:$0xff]   ;;  %2171 = vmatprep.subr.bf16.mxu0 %v2457_v0  ;;  %v2462_v5 = vld [vmem:[%s3429_s26 + $0x8] sm:$0xff]   ;;  %v2466_v9 = vld [vmem:[%s3429_s26 + $0x10] sm:$0xff]  }
  0x1e   :  { %v2459_v2 = vld [vmem:[%s3429_s26 + $0xc0] sm:$0xff]   ;;  %2172 = vmatpush3.bf16.msra.mxu0 %v2458_v1  ;;  %v2463_v6 = vld [vmem:[%s3429_s26 + $0xc8] sm:$0xff]   ;;  %v2467_v10 = vld [vmem:[%s3429_s26 + $0xd0] sm:$0xff]  }
  0x1f   :  { %v2460_v3 = vld [vmem:[%s3429_s26 + $0x80] sm:$0xff]   ;;  %2193 = vmatprep.subr.bf16.mxu1 %v2459_v2  ;;  %2173 = vmatprep.subr.bf16.mxu0 %v2461_v4  ;;  %v2464_v7 = vld [vmem:[%s3429_s26 + $0x88] sm:$0xff]   ;;  %v2468_v11 = vld [vmem:[%s3429_s26 + $0x90] sm:$0xff]  }
  0x20   :  { %2194 = vmatpush3.bf16.msra.mxu1 %v2460_v3  ;;  %v2469_v12 = vld [vmem:[%s3429_s26 + $0x58] sm:$0xff]   ;;  %v2473_v16 = vld [vmem:[%s3429_s26 + $0x60] sm:$0xff]   ;;  %v2477_v20 = vld [vmem:[%s3429_s26 + $0x68] sm:$0xff]  }
  0x21   :  { %2195 = vmatprep.subr.bf16.mxu1 %v2463_v6  ;;  %v2470_v13 = vld [vmem:[%s3429_s26 + $0x18] sm:$0xff]   ;;  %v2474_v17 = vld [vmem:[%s3429_s26 + $0x20] sm:$0xff]   ;;  %v2478_v21 = vld [vmem:[%s3429_s26 + $0x28] sm:$0xff]  }
  0x22   :  { %2174 = vmatpush3.bf16.msra.mxu0 %v2462_v5  ;;  %v2471_v14 = vld [vmem:[%s3429_s26 + $0xd8] sm:$0xff]   ;;  %v2475_v18 = vld [vmem:[%s3429_s26 + $0xe0] sm:$0xff]   ;;  %v2479_v22 = vld [vmem:[%s3429_s26 + $0xe8] sm:$0xff]  }
  0x23   :  { %2175 = vmatprep.subr.bf16.mxu0 %v2465_v8  ;;  %v2472_v15 = vld [vmem:[%s3429_s26 + $0x98] sm:$0xff]   ;;  %v2476_v19 = vld [vmem:[%s3429_s26 + $0xa0] sm:$0xff]   ;;  %v2480_v23 = vld [vmem:[%s3429_s26 + $0xa8] sm:$0xff]  }
  0x24   :  { %2196 = vmatpush3.bf16.msra.mxu1 %v2464_v7  ;;  %v2481_v24 = vld [vmem:[%s3429_s26 + $0x70] sm:$0xff]   ;;  %v2485_v28 = vld [vmem:[%s3429_s26 + $0x78] sm:$0xff]   ;;  %v73_v31 = vld [vmem:[%s3430_s29 + $0x8] sm:$0xff] }
  0x25   :  { %2197 = vmatprep.subr.bf16.mxu1 %v2467_v10  ;;  %v2482_v25 = vld [vmem:[%s3429_s26 + $0x30] sm:$0xff]   ;;  %v2486_v29 = vld [vmem:[%s3429_s26 + $0x38] sm:$0xff]   ;;  %v80_v32 = vld [vmem:[%s3430_s29 + $0x40] sm:$0xff] }
  0x26   :  { %2176 = vmatpush3.bf16.msra.mxu0 %v2466_v9  ;;  %v2483_v26 = vld [vmem:[%s3429_s26 + $0xf0] sm:$0xff]   ;;  %v2487_v30 = vld [vmem:[%s3429_s26 + $0xf8] sm:$0xff]   ;;  %v87_v33 = vpack.c.bf16 %v80_v32, %v73_v31  ;;  %v72_v35 = vld [vmem:[%s3430_s29] sm:$0xff] }
  0x27   :  { %2177 = vmatprep.subr.bf16.mxu0 %v2469_v12  ;;  %v2484_v27 = vld [vmem:[%s3429_s26 + $0xb0] sm:$0xff]   ;;  %v2488_v34 = vld [vmem:[%s3429_s26 + $0xb8] sm:$0xff]   ;;  %v2489_v38 = vld [vmem:[%s3429_s26 + $0x140] sm:$0xff]  }
  0x28   :  { %2198 = vmatpush3.bf16.msra.mxu1 %v2468_v11  ;;  %v79_v36 = vld [vmem:[%s3430_s29 + $0x38] sm:$0xff]  ;;  %528 = vmatprep.mubr.bf16.mxu0 %v87_v33  ;;  %v82_v40 = vld [vmem:[%s3430_s29 + $0x50] sm:$0xff]  ;;  %v2490_v42 = vld [vmem:[%s3429_s26 + $0x100] sm:$0xff]  }
  0x29   :  { %2199 = vmatprep.subr.bf16.mxu1 %v2471_v14  ;;  %v86_v37 = vpack.c.bf16 %v79_v36, %v72_v35  ;;  %v75_v39 = vld [vmem:[%s3430_s29 + $0x18] sm:$0xff]  ;;  %v74_v44 = vld [vmem:[%s3430_s29 + $0x10] sm:$0xff]  ;;  %v81_v45 = vld [vmem:[%s3430_s29 + $0x48] sm:$0xff] }
  0x2a   :  { %2178 = vmatpush3.bf16.msra.mxu0 %v2470_v13  ;;  %v89_v41 = vpack.c.bf16 %v82_v40, %v75_v39  ;;  %v88_v46 = vpack.c.bf16 %v81_v45, %v74_v44  ;;  %v2491_v47 = vld [vmem:[%s3429_s26 + $0x148] sm:$0xff]   ;;  %v2493_v49 = vld [vmem:[%s3429_s26 + $0x150] sm:$0xff]   ;;  %v2495_v51 = vld [vmem:[%s3429_s26 + $0x158] sm:$0xff]  }
  0x2b   :  { %2179 = vmatprep.subr.bf16.mxu0 %v2473_v16  ;;  %v2492_v48 = vld [vmem:[%s3429_s26 + $0x108] sm:$0xff]   ;;  %v2494_v50 = vld [vmem:[%s3429_s26 + $0x110] sm:$0xff]   ;;  %v2496_v52 = vld [vmem:[%s3429_s26 + $0x118] sm:$0xff]  }
  0x2c   :  { %2200 = vmatpush3.bf16.msra.mxu1 %v2472_v15  ;;  %569 = vmatprep.mubr.bf16.mxu1 %v89_v41  ;;  %v2497_v53 = vld [vmem:[%s3429_s26 + $0x160] sm:$0xff]   ;;  %v2499_v55 = vld [vmem:[%s3429_s26 + $0x168] sm:$0xff]   ;;  %v2501_v59 = vld [vmem:[%s3429_s26 + $0x170] sm:$0xff]  }
  0x2d   :  { %2201 = vmatprep.subr.bf16.mxu1 %v2475_v18  ;;  %v2498_v54 = vld [vmem:[%s3429_s26 + $0x120] sm:$0xff]   ;;  %v77_v57 = vld [vmem:[%s3430_s29 + $0x28] sm:$0xff]  ;;  %v78_v62 = vld [vmem:[%s3430_s29 + $0x30] sm:$0xff] }
  0x2e   :  { %2180 = vmatpush3.bf16.msra.mxu0 %v2474_v17  ;;  %v2505_v56 = vld [vmem:[%s3429_s26 + $0x180] sm:$0xff]   ;;  %v2500_v58 = vld [vmem:[%s3429_s26 + $0x128] sm:$0xff]   ;;  %v2502_v1 = vld [vmem:[%s3429_s26 + $0x130] sm:$0xff]  }
  0x2f   :  { %2181 = vmatprep.subr.bf16.mxu0 %v2477_v20  ;;  %v84_v60 = vld [vmem:[%s3430_s29 + $0x60] sm:$0xff]  ;;  %v85_v63 = vld [vmem:[%s3430_s29 + $0x68] sm:$0xff]  ;;  %v2503_v2 = vld [vmem:[%s3429_s26 + $0x178] sm:$0xff]  }
  0x30   :  { %2202 = vmatpush3.bf16.msra.mxu1 %v2476_v19  ;;  %v91_v61 = vpack.c.bf16 %v84_v60, %v77_v57  ;;  %v92_v0 = vpack.c.bf16 %v85_v63, %v78_v62  ;;  %v2504_v3 = vld [vmem:[%s3429_s26 + $0x138] sm:$0xff]   ;;  %v76_v4 = vld [vmem:[%s3430_s29 + $0x20] sm:$0xff]  ;;  %v2507_v8 = vld [vmem:[%s3410_s3 + $0x8] sm:$0xff]  }
  0x31   :  { %2203 = vmatprep.subr.bf16.mxu1 %v2479_v22  ;;  %v83_v5 = vld [vmem:[%s3430_s29 + $0x58] sm:$0xff]  ;;  %v2506_v7 = vld [vmem:[%s3410_s3] sm:$0xff]   ;;  %v2508_v9 = vld [vmem:[%s3410_s3 + $0x10] sm:$0xff]  }
  0x32   :  { %2182 = vmatpush3.bf16.msra.mxu0 %v2478_v21  ;;  %v90_v6 = vpack.c.bf16 %v83_v5, %v76_v4  ;;  %v2509_v10 = vld [vmem:[%s3410_s3 + $0x18] sm:$0xff]   ;;  %v2510_v11 = vld [vmem:[%s3410_s3 + $0x20] sm:$0xff]   ;;  %v2511_v12 = vld [vmem:[%s3410_s3 + $0x28] sm:$0xff]  }
  0x33   :  { %2183 = vmatprep.subr.bf16.mxu0 %v2481_v24  ;;  %v2512_v13 = vld [vmem:[%s3410_s3 + $0x30] sm:$0xff]   ;;  %v2513_v14 = vld [vmem:[%s3410_s3 + $0x38] sm:$0xff]   ;;  %v2514_v15 = vld [vmem:[%s3412_s5] sm:$0xff]  }
  0x34   :  { %2204 = vmatpush3.bf16.msra.mxu1 %v2480_v23  ;;  %v2515_v16 = vld [vmem:[%s3412_s5 + $0x8] sm:$0xff]   ;;  %v2516_v17 = vld [vmem:[%s3412_s5 + $0x10] sm:$0xff]   ;;  %v2517_v18 = vld [vmem:[%s3412_s5 + $0x18] sm:$0xff]  }
  0x35   :  { %2205 = vmatprep.subr.bf16.mxu1 %v2483_v26  ;;  %v2518_v19 = vld [vmem:[%s3412_s5 + $0x20] sm:$0xff]   ;;  %v2519_v20 = vld [vmem:[%s3412_s5 + $0x28] sm:$0xff]   ;;  %v2521_v57 = vld [vmem:[%s3412_s5 + $0x38] sm:$0xff]  }
  0x36   :  { %2184 = vmatpush3.bf16.msra.mxu0 %v2482_v25  ;;  %v1994_v22 = vld [vmem:[%s3409_s2] ss:$0 sm:$0xff]  ;;  %v2524_v60 = vld [vmem:[%s3414_s7 + $0x10] sm:$0xff]   ;;  %v2527_v63 = vld [vmem:[%s3414_s7 + $0x28] sm:$0xff]  }
  0x37   :  { %2185 = vmatprep.subr.bf16.mxu0 %v2485_v28  ;;  %v2526_v62 = vld [vmem:[%s3414_s7 + $0x20] sm:$0xff]  }
  0x38   :  { %2206 = vmatpush3.bf16.msra.mxu1 %v2484_v27 }
  0x39   :  { %2207 = vmatprep.subr.bf16.mxu1 %v2487_v30 }
  0x3a   :  { %2186 = vmatpush3.bf16.msra.mxu0 %v2486_v29 }
  0x3b   :  { %2215 = vmatprep.subr.bf16.mxu0 %v2489_v38 }
  0x3c   :  { %2208 = vmatpush3.bf16.msra.mxu1 %v2488_v34 }
  0x3d   :  { %2302 = vmatprep.subr.bf16.mxu1 %v2713_v43  ;;  %529 = vmatmul.mubr.bf16.vlgmr.msra.gmra.mrb[0].mxu0 %v86_v37 }
  0x3e   :  { %2216 = vmatpush3.bf16.msra.mxu0 %v2490_v42  ;;  %610 = vmatprep.mubr.bf16.mxu0 %v91_v61  ;;  %v2525_v61 = vld [vmem:[%s3414_s7 + $0x18] sm:$0xff]  }
  0x3f   :  { %570 = vmatmul.mubr.bf16.vlgmr.msra.gmra.mrb[0].mxu1 %v88_v46  ;;  %2217 = vmatprep.subr.bf16.mxu0 %v2491_v47 }
  0x40   :  { %2304 = vmatprep.mubr.msk.bf16.mxu1 %vm2714_vm0, %v2713_v43  ;;  %2303 = vmatpush3.bf16.msra.mxu1 %v2505_v56  ;;  %v2520_v56 = vld [vmem:[%s3412_s5 + $0x30] sm:$0xff]  }
  0x41   :  { %2308 = vmatprep.subr.bf16.mxu1 %v2713_v43 }
  0x42   :  { %2218 = vmatpush3.bf16.msra.mxu0 %v2492_v48 }
  0x43   :  { %2219 = vmatprep.subr.bf16.mxu0 %v2493_v49 }
  0x46   :  { %2220 = vmatpush3.bf16.msra.mxu0 %v2494_v50 }
  0x47   :  { %2221 = vmatprep.subr.bf16.mxu0 %v2495_v51  ;;  %2305 = vmatmul.mubr.msk.bf16.vlgmr.msra.gmra.mrb[4].mxu1 %vm492_vm1, %v92_v0  ;;  %v2045_v0 = vld [vmem:[%s3411_s4] ss:$0 sm:$0xff] }
  0x48   :  { %2324 = vmatprep.mubr.msk.bf16.mxu1 %vm2714_vm0, %v2713_v43  ;;  %2309 = vmatpush3.bf16.msra.mxu1 %v2506_v7 }
  0x49   :  { %2310 = vmatprep.subr.bf16.mxu1 %v2713_v43 }
  0x4a   :  { %2222 = vmatpush3.bf16.msra.mxu0 %v2496_v52 }
  0x4b   :  { %2223 = vmatprep.subr.bf16.mxu0 %v2497_v53 }
  0x4c   :  { %2311 = vmatpush3.bf16.msra.mxu1 %v2507_v8 }
  0x4d   :  { %2312 = vmatprep.subr.bf16.mxu1 %v2713_v43 }
  0x4e   :  { %2224 = vmatpush3.bf16.msra.mxu0 %v2498_v54 }
  0x4f   :  { %2225 = vmatprep.subr.bf16.mxu0 %v2499_v55 }
  0x50   :  { %2313 = vmatpush3.bf16.msra.mxu1 %v2508_v9 }
  0x51   :  { %2314 = vmatprep.subr.bf16.mxu1 %v2713_v43 }
  0x52   :  { %2226 = vmatpush3.bf16.msra.mxu0 %v2500_v58  ;;  %v2522_v58 = vld [vmem:[%s3414_s7] sm:$0xff]  }
  0x53   :  { %2227 = vmatprep.subr.bf16.mxu0 %v2501_v59  ;;  %v2523_v59 = vld [vmem:[%s3414_s7 + $0x8] sm:$0xff]  }
  0x54   :  { %2315 = vmatpush3.bf16.msra.mxu1 %v2509_v10  ;;  %v2528_v10 = vld [vmem:[%s3414_s7 + $0x30] sm:$0xff]  }
  0x55   :  { %2316 = vmatprep.subr.bf16.mxu1 %v2713_v43 }
  0x56   :  { %2228 = vmatpush3.bf16.msra.mxu0 %v2502_v1 }
  0x57   :  { %2229 = vmatprep.subr.bf16.mxu0 %v2503_v2 }
  0x58   :  { %2317 = vmatpush3.bf16.msra.mxu1 %v2510_v11  ;;  %v2529_v11 = vld [vmem:[%s3414_s7 + $0x38] sm:$0xff]  }
  0x59   :  { %2318 = vmatprep.subr.bf16.mxu1 %v2713_v43 }
  0x5a   :  { %2230 = vmatpush3.bf16.msra.mxu0 %v2504_v3 }
  0x5b   :  { %2328 = vmatprep.subr.bf16.mxu0 %v2713_v43 }
  0x5c   :  { %2319 = vmatpush3.bf16.msra.mxu1 %v2511_v12  ;;  %v2530_v12 = vld [vmem:[%s3416_s9] sm:$0xff]  }
  0x5d   :  { %611 = vmatmul.mubr.bf16.vlgmr.msra.gmra.mrb[4].mxu0 %v90_v6  ;;  %2320 = vmatprep.subr.bf16.mxu1 %v2713_v43 }
  0x5e   :  { %2344 = vmatprep.mubr.msk.bf16.mxu0 %vm2714_vm0, %v2713_v43  ;;  %2329 = vmatpush3.bf16.msra.mxu0 %v2514_v15  ;;  %v2533_v15 = vld [vmem:[%s3416_s9 + $0x18] sm:$0xff]  }
  0x5f   :  { %2330 = vmatprep.subr.bf16.mxu0 %v2713_v43 }
  0x60   :  { %2321 = vmatpush3.bf16.msra.mxu1 %v2512_v13  ;;  %v2531_v13 = vld [vmem:[%s3416_s9 + $0x8] sm:$0xff]  }
  0x61   :  { %2322 = vmatprep.subr.bf16.mxu1 %v2713_v43 }
  0x62   :  { %2331 = vmatpush3.bf16.msra.mxu0 %v2515_v16  ;;  %v2534_v16 = vld [vmem:[%s3416_s9 + $0x20] sm:$0xff]  }
  0x63   :  { %2332 = vmatprep.subr.bf16.mxu0 %v2713_v43 }
  0x64   :  { %2323 = vmatpush3.bf16.msra.mxu1 %v2513_v14  ;;  %v2532_v14 = vld [vmem:[%s3416_s9 + $0x10] sm:$0xff]  }
  0x65   :  { %2348 = vmatprep.subr.bf16.mxu1 %v2713_v43 }
  0x66   :  { %2333 = vmatpush3.bf16.msra.mxu0 %v2516_v17  ;;  %v2535_v17 = vld [vmem:[%s3416_s9 + $0x28] sm:$0xff]  }
  0x67   :  { %2334 = vmatprep.subr.bf16.mxu0 %v2713_v43 }
  0x6a   :  { %2335 = vmatpush3.bf16.msra.mxu0 %v2517_v18  ;;  %v2054_v18 = vld [vmem:[%s3413_s6] ss:$0 sm:$0xff] }
  0x6b   :  { %2336 = vmatprep.subr.bf16.mxu0 %v2713_v43 }
  0x6e   :  { %2337 = vmatpush3.bf16.msra.mxu0 %v2518_v19 }
  0x6f   :  { %2338 = vmatprep.subr.bf16.mxu0 %v2713_v43 }
  0x72   :  { %2339 = vmatpush3.bf16.msra.mxu0 %v2519_v20 }
  0x73   :  { %2340 = vmatprep.subr.bf16.mxu0 %v2713_v43 }
  0x76   :  { %2341 = vmatpush3.bf16.msra.mxu0 %v2520_v56 }
  0x77   :  { %2342 = vmatprep.subr.bf16.mxu0 %v2713_v43 }
  0x7a   :  { %2343 = vmatpush3.bf16.msra.mxu0 %v2521_v57 }
  0x7b   :  { %2368 = vmatprep.subr.bf16.mxu0 %v2713_v43 }
 0x110   :  { %v2187_v21 = vpop.f32.mrb[0].mxu0 }
 0x111   :  { %v2188_v23 = vpop.f32.mrb[1].mxu0 }
 0x112   :  { %v2189_v24 = vadd.f32 %v2188_v23, %v2187_v21  ;;  %v2190_v25 = vpop.f32.mrb[2].mxu0  ;;  %v2209_v26 = vpop.f32.mrb[0].mxu1 }
 0x113   :  { %v2191_v27 = vpop.f32.mrb[3].mxu0  ;;  %v2210_v30 = vpop.f32.mrb[1].mxu1 }
 0x114   :  { %v531_v28 = vadd.f32 %v2189_v24, %v1994_v22  ;;  %v2192_v29 = vadd.f32 %v2191_v27, %v2190_v25  ;;  %v2211_v31 = vadd.f32 %v2210_v30, %v2209_v26  ;;  %v2212_v32 = vpop.f32.mrb[2].mxu1  ;;  %v2538_v30 = vld [vmem:[%s3418_s11] sm:$0xff]  }
 0x115   :  { %v2213_v34 = vpop.f32.mrb[3].mxu1 }
 0x116   :  { %v534_v33 = vadd.f32 %v2192_v29, %v1994_v22  ;;  %v572_v35 = vadd.f32 %v2211_v31, %v531_v28  ;;  %v2214_v36 = vadd.f32 %v2213_v34, %v2212_v32  ;;  %v2536_v28 = vld [vmem:[%s3416_s9 + $0x30] sm:$0xff]   ;;  %v2537_v29 = vld [vmem:[%s3416_s9 + $0x38] sm:$0xff]   ;;  %v2539_v31 = vld [vmem:[%s3418_s11 + $0x8] sm:$0xff]  }
 0x117   :  { %v2540_v32 = vld [vmem:[%s3418_s11 + $0x10] sm:$0xff]   ;;  %v2542_v34 = vld [vmem:[%s3418_s11 + $0x20] sm:$0xff]  }
 0x118   :  { %v575_v37 = vadd.f32 %v2214_v36, %v534_v33  ;;  %v2541_v33 = vld [vmem:[%s3418_s11 + $0x18] sm:$0xff]   ;;  %v2063_v36 = vld [vmem:[%s3415_s8] ss:$0 sm:$0xff] }
 0x11a   :  { %v653_v38 = vpop.f32.mrb[4].mxu1 }
 0x11b   :  { %v2306_v39 = vpop.f32.mrb[5].mxu1 }
 0x11c   :  { %v656_v40 = vpop.f32.mrb[6].mxu1 }
 0x11d   :  { %v2307_v41 = vpop.f32.mrb[7].mxu1 }
 0x130   :  { %v2231_v42 = vpop.f32.mrb[4].mxu0 }
 0x131   :  { %v2232_v44 = vpop.f32.mrb[5].mxu0 }
 0x132   :  { %v2233_v45 = vadd.f32 %v2232_v44, %v2231_v42  ;;  %v2234_v46 = vpop.f32.mrb[6].mxu0 }
 0x133   :  { %v2235_v47 = vpop.f32.mrb[7].mxu0 }
 0x134   :  { %v613_v48 = vadd.f32 %v2233_v45, %v572_v35  ;;  %v2236_v49 = vadd.f32 %v2235_v47, %v2234_v46  ;;  %v2543_v35 = vld [vmem:[%s3418_s11 + $0x28] sm:$0xff]   ;;  %v2544_v45 = vld [vmem:[%s3418_s11 + $0x30] sm:$0xff]   ;;  %v2545_v46 = vld [vmem:[%s3418_s11 + $0x38] sm:$0xff]  }
 0x135   :  { %v2546_v47 = vld [vmem:[#allocation2] sm:$0xff]  }
 0x136   :  { %v654_v50 = vadd.f32 %v653_v38, %v613_v48  ;;  %v616_v51 = vadd.f32 %v2236_v49, %v575_v37  ;;  %v2547_v48 = vld [vmem:[#allocation2 + $0x8] sm:$0xff]   ;;  %v2548_v49 = vld [vmem:[#allocation2 + $0x10] sm:$0xff]  }
 0x138   :  { %v657_v52 = vadd.f32 %v656_v40, %v616_v51  ;;  %v660_v53 = vmax.f32 %v654_v50, 0.0  ;;  %v2549_v50 = vld [vmem:[#allocation2 + $0x18] sm:$0xff]   ;;  %v2550_v51 = vld [vmem:[#allocation2 + $0x20] sm:$0xff]  }
 0x13a   :  { %v661_v54 = vmax.f32 %v657_v52, 0.0  ;;  %v2551_v52 = vld [vmem:[#allocation2 + $0x28] sm:$0xff]  }
 0x13c   :  { %v662_v55 = vpack.c.bf16 %v661_v54, %v660_v53  ;;  %v2072_v53 = vld [vmem:[%s3417_s10] ss:$0 sm:$0xff] }
 0x13e   :  { %2325 = vmatmul.mubr.bf16.vlgmr.msra.gmra.mrb[8].mxu1 %v662_v55 }
 0x13f   :  { %2364 = vmatprep.mubr.msk.bf16.mxu1 %vm2714_vm0, %v2713_v43  ;;  %2349 = vmatpush3.bf16.msra.mxu1 %v2522_v58 }
 0x140   :  { %2350 = vmatprep.subr.bf16.mxu1 %v2713_v43 }
 0x143   :  { %2351 = vmatpush3.bf16.msra.mxu1 %v2523_v59 }
 0x144   :  { %2352 = vmatprep.subr.bf16.mxu1 %v2713_v43 }
 0x147   :  { %2353 = vmatpush3.bf16.msra.mxu1 %v2524_v60 }
 0x148   :  { %2354 = vmatprep.subr.bf16.mxu1 %v2713_v43 }
 0x14b   :  { %2355 = vmatpush3.bf16.msra.mxu1 %v2525_v61 }
 0x14c   :  { %2356 = vmatprep.subr.bf16.mxu1 %v2713_v43 }
 0x14f   :  { %2357 = vmatpush3.bf16.msra.mxu1 %v2526_v62 }
 0x150   :  { %2358 = vmatprep.subr.bf16.mxu1 %v2713_v43 }
 0x153   :  { %2359 = vmatpush3.bf16.msra.mxu1 %v2527_v63  ;;  %v2552_v63 = vld [vmem:[#allocation2 + $0x30] sm:$0xff]  }
 0x154   :  { %2360 = vmatprep.subr.bf16.mxu1 %v2713_v43 }
 0x157   :  { %2361 = vmatpush3.bf16.msra.mxu1 %v2528_v10  ;;  %v2580_v10 = vld [vmem:[%s3422_s15 + $0xe4] ss:$28 sps:$4 sm:$0xff]  }
 0x158   :  { %2362 = vmatprep.subr.bf16.mxu1 %v2713_v43 }
 0x15b   :  { %2363 = vmatpush3.bf16.msra.mxu1 %v2529_v11  ;;  %v2578_v11 = vld [vmem:[%s3422_s15 + $0xe0] ss:$28 sps:$4 sm:$0xff]  }
 0x15c   :  { %2388 = vmatprep.subr.bf16.mxu1 %v2713_v43 }
 0x211   :  { %v768_v1 = vpop.f32.mrb[8].mxu1 }
 0x212   :  { %v769_v2 = vadd.f32 %v2045_v0, %v768_v1  ;;  %v2326_v3 = vpop.f32.mrb[9].mxu1  ;;  %v2554_v1 = vld [vmem:[%s3422_s15] ss:$28 sps:$4 sm:$0xff]  }
 0x213   :  { %v771_v4 = vpop.f32.mrb[10].mxu1  ;;  %v2559_v3 = vld [vmem:[%s3422_s15 + $0xc] ss:$28 sps:$4 sm:$0xff]  }
 0x214   :  { %v772_v5 = vadd.f32 %v2045_v0, %v771_v4  ;;  %v2327_v6 = vpop.f32.mrb[11].mxu1  ;;  %v775_v7 = vmax.f32 %v769_v2, 0.0  ;;  %v2553_v0 = vld [vmem:[#allocation2 + $0x38] sm:$0xff]   ;;  %v2556_v2 = vld [vmem:[%s3422_s15 + $0x4] ss:$28 sps:$4 sm:$0xff]  }
 0x215   :  { %v2562_v4 = vld [vmem:[%s3422_s15 + $0x3c] ss:$28 sps:$4 sm:$0xff]   ;;  %v2568_v6 = vld [vmem:[%s3422_s15 + $0x74] ss:$28 sps:$4 sm:$0xff]  }
 0x216   :  { %v776_v8 = vmax.f32 %v772_v5, 0.0  ;;  %v2560_v5 = vld [vmem:[%s3422_s15 + $0x38] ss:$28 sps:$4 sm:$0xff]  }
 0x218   :  { %v777_v9 = vpack.c.bf16 %v776_v8, %v775_v7  ;;  %v2566_v7 = vld [vmem:[%s3422_s15 + $0x70] ss:$28 sps:$4 sm:$0xff]  }
 0x219   :  { %v2574_v8 = vld [vmem:[%s3422_s15 + $0xac] ss:$28 sps:$4 sm:$0xff]  }
 0x21a   :  { %2345 = vmatmul.mubr.bf16.vlgmr.msra.gmra.mrb[8].mxu0 %v777_v9  ;;  %v2572_v9 = vld [vmem:[%s3422_s15 + $0xa8] ss:$28 sps:$4 sm:$0xff]  }
 0x21b   :  { %2384 = vmatprep.mubr.msk.bf16.mxu0 %vm2714_vm0, %v2713_v43  ;;  %2369 = vmatpush3.bf16.msra.mxu0 %v2530_v12  ;;  %v2586_v12 = vld [vmem:[%s3422_s15 + $0x11c] ss:$28 sps:$4 sm:$0xff]  }
 0x21c   :  { %2370 = vmatprep.subr.bf16.mxu0 %v2713_v43 }
 0x21f   :  { %2371 = vmatpush3.bf16.msra.mxu0 %v2531_v13  ;;  %v2584_v13 = vld [vmem:[%s3422_s15 + $0x118] ss:$28 sps:$4 sm:$0xff]  }
 0x220   :  { %2372 = vmatprep.subr.bf16.mxu0 %v2713_v43 }
 0x223   :  { %2373 = vmatpush3.bf16.msra.mxu0 %v2532_v14  ;;  %v2081_v14 = vld [vmem:[%s3419_s12] ss:$0 sm:$0xff] }
 0x224   :  { %2374 = vmatprep.subr.bf16.mxu0 %v2713_v43 }
 0x227   :  { %2375 = vmatpush3.bf16.msra.mxu0 %v2533_v15 }
 0x228   :  { %2376 = vmatprep.subr.bf16.mxu0 %v2713_v43 }
 0x22b   :  { %2377 = vmatpush3.bf16.msra.mxu0 %v2534_v16 }
 0x22c   :  { %2378 = vmatprep.subr.bf16.mxu0 %v2713_v43 }
 0x22f   :  { %2379 = vmatpush3.bf16.msra.mxu0 %v2535_v17 }
 0x230   :  { %2380 = vmatprep.subr.bf16.mxu0 %v2713_v43 }
 0x233   :  { %2381 = vmatpush3.bf16.msra.mxu0 %v2536_v28  ;;  %v2569_v28 = vld [vmem:[%s3422_s15 + $0x78] ss:$28 sps:$4 sm:$0xff]  }
 0x234   :  { %2382 = vmatprep.subr.bf16.mxu0 %v2713_v43 }
 0x237   :  { %2383 = vmatpush3.bf16.msra.mxu0 %v2537_v29  ;;  %v2577_v29 = vld [vmem:[%s3422_s15 + $0xb4] ss:$28 sps:$4 sm:$0xff]  }
 0x238   :  { %2408 = vmatprep.subr.bf16.mxu0 %v2713_v43 }
 0x2ed   :  { %v883_v19 = vpop.f32.mrb[8].mxu0 }
 0x2ee   :  { %v884_v20 = vadd.f32 %v2054_v18, %v883_v19  ;;  %v2346_v21 = vpop.f32.mrb[9].mxu0 }
 0x2ef   :  { %v886_v22 = vpop.f32.mrb[10].mxu0 }
 0x2f0   :  { %v887_v23 = vadd.f32 %v2054_v18, %v886_v22  ;;  %v2347_v24 = vpop.f32.mrb[11].mxu0  ;;  %v890_v25 = vmax.f32 %v884_v20, 0.0 }
 0x2f2   :  { %v891_v26 = vmax.f32 %v887_v23, 0.0  ;;  %v2557_v23 = vld [vmem:[%s3422_s15 + $0x8] ss:$28 sps:$4 sm:$0xff]  }
 0x2f4   :  { %v892_v27 = vpack.c.bf16 %v891_v26, %v890_v25  ;;  %v2565_v25 = vld [vmem:[%s3422_s15 + $0x44] ss:$28 sps:$4 sm:$0xff]  }
 0x2f5   :  { %v2563_v26 = vld [vmem:[%s3422_s15 + $0x40] ss:$28 sps:$4 sm:$0xff]  }
 0x2f6   :  { %2365 = vmatmul.mubr.bf16.vlgmr.msra.gmra.mrb[12].mxu1 %v892_v27  ;;  %v2571_v27 = vld [vmem:[%s3422_s15 + $0x7c] ss:$28 sps:$4 sm:$0xff]  }
 0x2f7   :  { %2404 = vmatprep.mubr.msk.bf16.mxu1 %vm2714_vm0, %v2713_v43  ;;  %2389 = vmatpush3.bf16.msra.mxu1 %v2538_v30  ;;  %v2575_v30 = vld [vmem:[%s3422_s15 + $0xb0] ss:$28 sps:$4 sm:$0xff]  }
 0x2f8   :  { %2390 = vmatprep.subr.bf16.mxu1 %v2713_v43 }
 0x2fb   :  { %2391 = vmatpush3.bf16.msra.mxu1 %v2539_v31  ;;  %v2583_v31 = vld [vmem:[%s3422_s15 + $0xec] ss:$28 sps:$4 sm:$0xff]  }
 0x2fc   :  { %2392 = vmatprep.subr.bf16.mxu1 %v2713_v43 }
 0x2ff   :  { %2393 = vmatpush3.bf16.msra.mxu1 %v2540_v32  ;;  %v2581_v32 = vld [vmem:[%s3422_s15 + $0xe8] ss:$28 sps:$4 sm:$0xff]  }
 0x300   :  { %2394 = vmatprep.subr.bf16.mxu1 %v2713_v43 }
 0x303   :  { %2395 = vmatpush3.bf16.msra.mxu1 %v2541_v33  ;;  %v2589_v33 = vld [vmem:[%s3422_s15 + $0x124] ss:$28 sps:$4 sm:$0xff]  }
 0x304   :  { %2396 = vmatprep.subr.bf16.mxu1 %v2713_v43 }
 0x307   :  { %2397 = vmatpush3.bf16.msra.mxu1 %v2542_v34  ;;  %v2587_v34 = vld [vmem:[%s3422_s15 + $0x120] ss:$28 sps:$4 sm:$0xff]  }
 0x308   :  { %2398 = vmatprep.subr.bf16.mxu1 %v2713_v43 }
 0x30b   :  { %2399 = vmatpush3.bf16.msra.mxu1 %v2543_v35  ;;  %v2592_v35 = vld [vmem:[%s3422_s15 + $0x154] ss:$28 sps:$4 sm:$0xff]  }
 0x30c   :  { %2400 = vmatprep.subr.bf16.mxu1 %v2713_v43 }
 0x30f   :  { %2401 = vmatpush3.bf16.msra.mxu1 %v2544_v45  ;;  %v2715_v45 = vmov 0  }
 0x310   :  { %2402 = vmatprep.subr.bf16.mxu1 %v2713_v43 }
 0x313   :  { %2403 = vmatpush3.bf16.msra.mxu1 %v2545_v46  ;;  %v2090_v46 = vld [vmem:[%s3421_s14] ss:$0 sm:$0xff] }
 0x314   :  { %1740 = vmatprep.subr.bf16.mxu1 %v2556_v2  ;;  %v2617_v2 = vld [vmem:[%s3422_s15 + $0xc0] ss:$28 sps:$4 sm:$0xff]  }
 0x3c9   :  { %v998_v37 = vpop.f32.mrb[12].mxu1 }
 0x3ca   :  { %v2366_v38 = vpop.f32.mrb[13].mxu1  ;;  %v999_v40 = vadd.f32 %v2063_v36, %v998_v37  ;;  %v2590_v37 = vld [vmem:[%s3422_s15 + $0x150] ss:$28 sps:$4 sm:$0xff]  }
 0x3cb   :  { %v1001_v39 = vpop.f32.mrb[14].mxu1  ;;  %v2593_v38 = vld [vmem:[%s3422_s15 + $0x158] ss:$28 sps:$4 sm:$0xff]  }
 0x3cc   :  { %v1002_v41 = vadd.f32 %v2063_v36, %v1001_v39  ;;  %v2367_v42 = vpop.f32.mrb[15].mxu1  ;;  %v2595_v36 = vld [vmem:[%s3422_s15 + $0x15c] ss:$28 sps:$4 sm:$0xff]   ;;  %v2598_v39 = vld [vmem:[%s3422_s15 + $0x18c] ss:$28 sps:$4 sm:$0xff]  }
 0x3cd   :  { %v2599_v42 = vld [vmem:[%s3422_s15 + $0x190] ss:$28 sps:$4 sm:$0xff]  }
 0x3ce   :  { %v1005_v44 = vpack.c.bf16 %v1002_v41, %v999_v40  ;;  %v2601_v40 = vld [vmem:[%s3422_s15 + $0x194] ss:$28 sps:$4 sm:$0xff]   ;;  %v2596_v41 = vld [vmem:[%s3422_s15 + $0x188] ss:$28 sps:$4 sm:$0xff]  }
 0x3d0   :  { %2385 = vmatmul.mubr.bf16.vlgmr.msra.gmra.mrb[12].mxu0 %v1005_v44  ;;  %v2604_v44 = vld [vmem:[%s3422_s15 + $0x14] ss:$28 sps:$4 sm:$0xff]  }
 0x3d1   :  { %2424 = vmatprep.mubr.msk.bf16.mxu0 %vm2714_vm0, %v2713_v43  ;;  %2409 = vmatpush3.bf16.msra.mxu0 %v2546_v47 }
 0x3d2   :  { %2410 = vmatprep.subr.bf16.mxu0 %v2713_v43 }
 0x3d5   :  { %2411 = vmatpush3.bf16.msra.mxu0 %v2547_v48 }
 0x3d6   :  { %2412 = vmatprep.subr.bf16.mxu0 %v2713_v43 }
 0x3d9   :  { %2413 = vmatpush3.bf16.msra.mxu0 %v2548_v49 }
 0x3da   :  { %2414 = vmatprep.subr.bf16.mxu0 %v2713_v43 }
 0x3dd   :  { %2415 = vmatpush3.bf16.msra.mxu0 %v2549_v50 }
 0x3de   :  { %2416 = vmatprep.subr.bf16.mxu0 %v2713_v43 }
 0x3e1   :  { %2417 = vmatpush3.bf16.msra.mxu0 %v2550_v51 }
 0x3e2   :  { %2418 = vmatprep.subr.bf16.mxu0 %v2713_v43 }
 0x3e5   :  { %2419 = vmatpush3.bf16.msra.mxu0 %v2551_v52 }
 0x3e6   :  { %2420 = vmatprep.subr.bf16.mxu0 %v2713_v43 }
 0x3e9   :  { %2421 = vmatpush3.bf16.msra.mxu0 %v2552_v63  ;;  %v2613_v63 = vld [vmem:[%s3422_s15 + $0x88] ss:$28 sps:$4 sm:$0xff]  }
 0x3ea   :  { %2422 = vmatprep.subr.bf16.mxu0 %v2713_v43 }
 0x3ed   :  { %2423 = vmatpush3.bf16.msra.mxu0 %v2553_v0  ;;  %v2616_v0 = vld [vmem:[%s3422_s15 + $0xbc] ss:$28 sps:$4 sm:$0xff]  }
 0x3ee   :  { %1783 = vmatprep.subr.bf16.mxu0 %v2559_v3  ;;  %v2620_v3 = vld [vmem:[%s3422_s15 + $0xf4] ss:$28 sps:$4 sm:$0xff]  }
 0x4a3   :  { %v1111_v54 = vpop.f32.mrb[12].mxu0 }
 0x4a4   :  { %v1112_v55 = vadd.f32 %v2072_v53, %v1111_v54  ;;  %v2386_v56 = vpop.f32.mrb[13].mxu0 }
 0x4a5   :  { %v1114_v57 = vpop.f32.mrb[14].mxu0  ;;  %v2605_v56 = vld [vmem:[%s3422_s15 + $0x18] ss:$28 sps:$4 sm:$0xff]  }
 0x4a6   :  { %v1115_v58 = vadd.f32 %v2072_v53, %v1114_v57  ;;  %v2387_v59 = vpop.f32.mrb[15].mxu0  ;;  %v1118_v60 = vmax.f32 %v1112_v55, 0.0  ;;  %v2602_v55 = vld [vmem:[%s3422_s15 + $0x10] ss:$28 sps:$4 sm:$0xff]  }
 0x4a7   :  { %v2606_v59 = vld [vmem:[%s3422_s15 + $0x48] ss:$28 sps:$4 sm:$0xff]  }
 0x4a8   :  { %v1119_v61 = vmax.f32 %v1115_v58, 0.0  ;;  %v2608_v58 = vld [vmem:[%s3422_s15 + $0x4c] ss:$28 sps:$4 sm:$0xff]  }
 0x4aa   :  { %v1120_v62 = vpack.c.bf16 %v1119_v61, %v1118_v60  ;;  %v2609_v60 = vld [vmem:[%s3422_s15 + $0x50] ss:$28 sps:$4 sm:$0xff]   ;;  %v2612_v61 = vld [vmem:[%s3422_s15 + $0x84] ss:$28 sps:$4 sm:$0xff]  }
 0x4ac   :  { %2405 = vmatmul.mubr.bf16.vlgmr.msra.gmra.mrb[16].mxu1 %v1120_v62  ;;  %v2610_v62 = vld [vmem:[%s3422_s15 + $0x80] ss:$28 sps:$4 sm:$0xff]  }
 0x4ad   :  { %1741 = vmatpush1.bf16.msra.mxu1 %v2554_v1  ;;  %1772 = vmatprep.mubr.bf16.mxu1 %v2715_v45  ;;  %v2614_v1 = vld [vmem:[%s3422_s15 + $0xb8] ss:$28 sps:$4 sm:$0xff]  }
 0x4ae   :  { %1742 = vmatprep.subr.bf16.mxu1 %v2562_v4  ;;  %v2618_v4 = vld [vmem:[%s3422_s15 + $0xf0] ss:$28 sps:$4 sm:$0xff]  }
 0x4b1   :  { %1743 = vmatpush1.bf16.msra.mxu1 %v2560_v5  ;;  %v2621_v5 = vld [vmem:[%s3422_s15 + $0xf8] ss:$28 sps:$4 sm:$0xff]  }
 0x4b2   :  { %1744 = vmatprep.subr.bf16.mxu1 %v2568_v6  ;;  %v2624_v6 = vld [vmem:[%s3422_s15 + $0x12c] ss:$28 sps:$4 sm:$0xff]  }
 0x4b5   :  { %1745 = vmatpush1.bf16.msra.mxu1 %v2566_v7  ;;  %v2622_v7 = vld [vmem:[%s3422_s15 + $0x128] ss:$28 sps:$4 sm:$0xff]  }
 0x4b6   :  { %1746 = vmatprep.subr.bf16.mxu1 %v2574_v8  ;;  %v2625_v8 = vld [vmem:[%s3422_s15 + $0x130] ss:$28 sps:$4 sm:$0xff]  }
 0x4b9   :  { %1747 = vmatpush1.bf16.msra.mxu1 %v2572_v9  ;;  %v2628_v9 = vld [vmem:[%s3422_s15 + $0x164] ss:$28 sps:$4 sm:$0xff]  }
 0x4ba   :  { %1748 = vmatprep.subr.bf16.mxu1 %v2580_v10  ;;  %v2626_v10 = vld [vmem:[%s3422_s15 + $0x160] ss:$28 sps:$4 sm:$0xff]  }
 0x4bd   :  { %1749 = vmatpush1.bf16.msra.mxu1 %v2578_v11  ;;  %v2629_v11 = vld [vmem:[%s3422_s15 + $0x168] ss:$28 sps:$4 sm:$0xff]  }
 0x4be   :  { %1750 = vmatprep.subr.bf16.mxu1 %v2586_v12  ;;  %v2632_v12 = vld [vmem:[%s3422_s15 + $0x19c] ss:$28 sps:$4 sm:$0xff]  }
 0x4c1   :  { %1751 = vmatpush1.bf16.msra.mxu1 %v2584_v13  ;;  %v2630_v13 = vld [vmem:[%s3422_s15 + $0x198] ss:$28 sps:$4 sm:$0xff]  }
 0x4c2   :  { %1752 = vmatprep.subr.bf16.mxu1 %v2592_v35 }
 0x4c5   :  { %1753 = vmatpush1.bf16.msra.mxu1 %v2590_v37 }
 0x4c6   :  { %1754 = vmatprep.subr.bf16.mxu1 %v2598_v39 }
 0x4c9   :  { %1755 = vmatpush1.bf16.msra.mxu1 %v2596_v41 }
 0x4ca   :  { %1826 = vmatprep.subr.bf16.mxu1 %v2604_v44 }
 0x57f   :  { %v1226_v15 = vpop.f32.mrb[16].mxu1 }
 0x580   :  { %v1227_v16 = vadd.f32 %v2081_v14, %v1226_v15  ;;  %v2406_v17 = vpop.f32.mrb[17].mxu1  ;;  %v1417_v15 = vlaneseq }
 0x581   :  { %v1229_v18 = vpop.f32.mrb[18].mxu1 }
 0x582   :  { %v1230_v19 = vadd.f32 %v2081_v14, %v1229_v18  ;;  %v2407_v20 = vpop.f32.mrb[19].mxu1  ;;  %v1233_v21 = vmax.f32 %v1227_v16, 0.0  ;;  %v2633_v14 = vld [vmem:[%s3422_s15 + $0x1a0] ss:$28 sps:$4 sm:$0xff]   ;;  %v1418_v16 = vshrl.u32 %v1417_v15, 7  ;;  %s2716_s15 = smov [#allocation5]  }
 0x584   :  { %v1234_v22 = vmax.f32 %v1230_v19, 0.0  ;;  %v1419_v17 = vsub.s32 0, %v1418_v16  ;;  %v1427_v18 = vsub.s32 2, %v1418_v16  ;;  %v1415_v19 = vld [vmem:[%s3423_s16] sm:$0x7f]  ;;  %v1423_v20 = vsub.s32 1, %v1418_v16 }
 0x585   :  { %s1982_s16 = sshll.u32 %s2716_s15, 4  ;;  %s1983_s16 = int_to_ptr.vmem [resolvable:$true] %s1982_s16 }
 0x586   :  { %v1235_v24 = vpack.c.bf16 %v1234_v22, %v1233_v21  ;;  %v1431_v21 = vsub.s32 3, %v1418_v16  ;;  %v1420_v22 = vrot.slane %v1415_v19, %v1419_v17  ;;  %s2684_s4 = scalar_lea.vmem %s1983_s16, 896  ;;  %p2689_p9 = scmp.lt.s32.totalorder %s1983_s16, %s1983_s16 }
 0x587   :  { %p2685_p8 = scmp.ne.s32.totalorder %s1983_s16, %s2684_s4  ;;  %p2690_p10 = scmp.lt.s32.totalorder %s2684_s4, %s2684_s4 }
 0x588   :  { %2425 = vmatmul.mubr.bf16.vlgmr.msra.gmra.mrb[16].mxu0 %v1235_v24  ;;  %v1424_v24 = vrot.slane %v1415_v19, %v1423_v20 }
 0x589   :  { %1784 = vmatpush1.bf16.msra.mxu0 %v2557_v23  ;;  %1815 = vmatprep.mubr.bf16.mxu0 %v2715_v45  ;;  %v1428_v23 = vrot.slane %v1415_v19, %v1427_v18  ;;  %p2691_p11 = por %p2690_p10, %p2689_p9 }
 0x58a   :  { %1785 = vmatprep.subr.bf16.mxu0 %v2565_v25  ;;  %v1432_v25 = vrot.slane %v1415_v19, %v1431_v21 }
 0x58b   :  { %p2692_p12 = pnand %p2691_p11, %p2685_p8 }
 0x58d   :  { %1786 = vmatpush1.bf16.msra.mxu0 %v2563_v26 }
 0x58e   :  { %1787 = vmatprep.subr.bf16.mxu0 %v2571_v27 }
 0x591   :  { %1788 = vmatpush1.bf16.msra.mxu0 %v2569_v28 }
 0x592   :  { %1789 = vmatprep.subr.bf16.mxu0 %v2577_v29 }
 0x595   :  { %1790 = vmatpush1.bf16.msra.mxu0 %v2575_v30 }
 0x596   :  { %1791 = vmatprep.subr.bf16.mxu0 %v2583_v31 }
 0x599   :  { %1792 = vmatpush1.bf16.msra.mxu0 %v2581_v32 }
 0x59a   :  { %1793 = vmatprep.subr.bf16.mxu0 %v2589_v33 }
 0x59d   :  { %1794 = vmatpush1.bf16.msra.mxu0 %v2587_v34 }
 0x59e   :  { %1795 = vmatprep.subr.bf16.mxu0 %v2595_v36 }
 0x5a1   :  { %1796 = vmatpush1.bf16.msra.mxu0 %v2593_v38 }
 0x5a2   :  { %1797 = vmatprep.subr.bf16.mxu0 %v2601_v40 }
 0x5a5   :  { %1798 = vmatpush1.bf16.msra.mxu0 %v2599_v42 }
 0x5a6   :  { %2428 = vmatprep.subr.bf16.mxu0 %v2713_v43 }
 0x65b   :  { %v1341_v47 = vpop.f32.mrb[16].mxu0 }
 0x65c   :  { %v1342_v48 = vadd.f32 %v2090_v46, %v1341_v47  ;;  %v2426_v49 = vpop.f32.mrb[17].mxu0 }
 0x65d   :  { %v1344_v50 = vpop.f32.mrb[18].mxu0 }
 0x65e   :  { %v1345_v51 = vadd.f32 %v2090_v46, %v1344_v50  ;;  %v2427_v52 = vpop.f32.mrb[19].mxu0  ;;  %v1348_v53 = vmax.f32 %v1342_v48, 0.0 }
 0x660   :  { %v1349_v54 = vmax.f32 %v1345_v51, 0.0 }
 0x662   :  { %v1350_v57 = vpack.c.bf16 %v1349_v54, %v1348_v53  ;;  %v1435_v54 = vsub.s32 4, %v1418_v16 }
 0x664   :  { %1773 = vmatmul.mubr.bf16.vlgmr.msra.gmra.mrb[20].mxu1 %v1350_v57  ;;  %1816 = vmatmul.mubr.bf16.vlgmr.msra.gmra.mrb[20].mxu0 %v1350_v57 }
 0x665   :  { %1827 = vmatpush1.bf16.msra.mxu1 %v2602_v55  ;;  %2429 = vmatpush3.bf16.msra.mxu0 %v2605_v56  ;;  %v1443_v55 = vsub.s32 6, %v1418_v16  ;;  %v1439_v56 = vsub.s32 5, %v1418_v16 }
 0x666   :  { %1828 = vmatprep.subr.bf16.mxu1 %v2608_v58  ;;  %2430 = vmatprep.subr.bf16.mxu0 %v2713_v43 }
 0x667   :  { %1858 = vmatprep.mubr.bf16.mxu1 %v2715_v45  ;;  %2444 = vmatprep.mubr.msk.bf16.mxu0 %vm2714_vm0, %v2713_v43  ;;  %v1444_v58 = vrot.slane %v1415_v19, %v1443_v55 }
 0x669   :  { %1829 = vmatpush1.bf16.msra.mxu1 %v2606_v59  ;;  %2431 = vmatpush3.bf16.msra.mxu0 %v2609_v60  ;;  %v1440_v59 = vrot.slane %v1415_v19, %v1439_v56 }
 0x66a   :  { %1830 = vmatprep.subr.bf16.mxu1 %v2612_v61  ;;  %2432 = vmatprep.subr.bf16.mxu0 %v2713_v43 }
 0x66d   :  { %1831 = vmatpush1.bf16.msra.mxu1 %v2610_v62  ;;  %2433 = vmatpush3.bf16.msra.mxu0 %v2613_v63 }
 0x66e   :  { %1832 = vmatprep.subr.bf16.mxu1 %v2616_v0  ;;  %2434 = vmatprep.subr.bf16.mxu0 %v2713_v43 }
 0x671   :  { %1833 = vmatpush1.bf16.msra.mxu1 %v2614_v1  ;;  %2435 = vmatpush3.bf16.msra.mxu0 %v2617_v2 }
 0x672   :  { %1834 = vmatprep.subr.bf16.mxu1 %v2620_v3  ;;  %2436 = vmatprep.subr.bf16.mxu0 %v2713_v43 }
 0x675   :  { %1835 = vmatpush1.bf16.msra.mxu1 %v2618_v4  ;;  %2437 = vmatpush3.bf16.msra.mxu0 %v2621_v5 }
 0x676   :  { %1836 = vmatprep.subr.bf16.mxu1 %v2624_v6  ;;  %2438 = vmatprep.subr.bf16.mxu0 %v2713_v43 }
 0x679   :  { %1837 = vmatpush1.bf16.msra.mxu1 %v2622_v7  ;;  %2439 = vmatpush3.bf16.msra.mxu0 %v2625_v8 }
 0x67a   :  { %1838 = vmatprep.subr.bf16.mxu1 %v2628_v9  ;;  %2440 = vmatprep.subr.bf16.mxu0 %v2713_v43 }
 0x67d   :  { %1839 = vmatpush1.bf16.msra.mxu1 %v2626_v10  ;;  %2441 = vmatpush3.bf16.msra.mxu0 %v2629_v11 }
 0x67e   :  { %1840 = vmatprep.subr.bf16.mxu1 %v2632_v12  ;;  %2442 = vmatprep.subr.bf16.mxu0 %v2713_v43 }
 0x681   :  { %1841 = vmatpush1.bf16.msra.mxu1 %v2630_v13  ;;  %2443 = vmatpush3.bf16.msra.mxu0 %v2633_v14 }
 0x684   :  { %1859 = vmatmul.mubr.bf16.vlgmr.msra.gmra.mrb[24].mxu1 %v1350_v57  ;;  %2445 = vmatmul.mubr.bf16.vlgmr.msra.gmra.mrb[24].mxu0 %v1350_v57  ;;  %v1436_v57 = vrot.slane %v1415_v19, %v1435_v54 }
 0x737   :  { %v1774_v26 = vpop.f32.mrb[20].mxu1  ;;  %v1817_v43 = vpop.f32.mrb[20].mxu0 }
 0x738   :  { %v1775_v27 = vadd.f32 %v1774_v26, %v1420_v22  ;;  %v1818_v28 = vadd.f32 %v1817_v43, %v1428_v23  ;;  %v1776_v29 = vpop.f32.mrb[21].mxu1  ;;  %v1819_v30 = vpop.f32.mrb[21].mxu0 }
 0x739   :  { %v1777_v31 = vadd.f32 %v1776_v29, %v1424_v24  ;;  %v1820_v32 = vadd.f32 %v1819_v30, %v1432_v25  ;;  %v1778_v33 = vpop.f32.mrb[22].mxu1  ;;  %v1821_v34 = vpop.f32.mrb[22].mxu0 }
 0x73a   :  { %2634 = vtanh.f32 %v1775_v27  ;;  %v1779_v35 = vadd.f32 %v1778_v33, %v1420_v22  ;;  %v1780_v36 = vpop.f32.mrb[23].mxu1  ;;  %v1823_v37 = vpop.f32.mrb[23].mxu0  ;;  %v1822_v38 = vadd.f32 %v1821_v34, %v1428_v23 }
 0x73b   :  { %2636 = vtanh.f32 %v1818_v28  ;;  %v1781_v39 = vadd.f32 %v1780_v36, %v1424_v24  ;;  %v1824_v40 = vadd.f32 %v1823_v37, %v1432_v25 }
 0x73c   :  { %2638 = vtanh.f32 %v1777_v31 }
 0x73d   :  { %2640 = vtanh.f32 %v1820_v32 }
 0x73e   :  { %2642 = vtanh.f32 %v1779_v35 }
 0x73f   :  { %2644 = vtanh.f32 %v1822_v38 }
 0x740   :  { %2646 = vtanh.f32 %v1781_v39 }
 0x741   :  { %2648 = vtanh.f32 %v1824_v40 }
 0x744   :  { %v2635_v41 = vpop.eup %2634 }
 0x745   :  { %v2637_v42 = vpop.eup %2636 }
 0x746   :  { %v2639_v44 = vpop.eup %2638 }
 0x747   :  { %v2641_v45 = vpop.eup %2640  ;;  %v2163_v46 = vpack.c.bf16 %v2639_v44, %v2635_v41 }
 0x748   :  { %v2643_v47 = vpop.eup %2642  ;;  %v2164_v48 = vpack.c.bf16 %v2641_v45, %v2637_v42 }
 0x749   :  { %v2645_v49 = vpop.eup %2644  ;;  %1968 = vst [vmem:[#allocation5] sm:$0xff] %v2163_v46 }
 0x74a   :  { %v2647_v50 = vpop.eup %2646  ;;  %1969 = vst [vmem:[#allocation5 + $0x8] sm:$0xff] %v2164_v48 }
 0x74b   :  { %v2649_v51 = vpop.eup %2648  ;;  %v2167_v52 = vpack.c.bf16 %v2647_v50, %v2643_v47 }
 0x74c   :  { %v2168_v53 = vpack.c.bf16 %v2649_v51, %v2645_v49 }
 0x74d   :  { %1973 = vst [vmem:[#allocation5 + $0x1c] sm:$0xff] %v2167_v52 }
 0x74e   :  { %1974 = vst [vmem:[#allocation5 + $0x24] sm:$0xff] %v2168_v53 }
 0x757   :  { %v1860_v60 = vpop.f32.mrb[24].mxu1  ;;  %v1903_v61 = vpop.f32.mrb[24].mxu0 }
 0x758   :  { %v1861_v62 = vadd.f32 %v1860_v60, %v1436_v57  ;;  %v1904_v63 = vadd.f32 %v1903_v61, %v1444_v58  ;;  %v1862_v0 = vpop.f32.mrb[25].mxu1  ;;  %v2446_v1 = vpop.f32.mrb[25].mxu0 }
 0x759   :  { %v1863_v2 = vadd.f32 %v1862_v0, %v1440_v59  ;;  %v1864_v3 = vpop.f32.mrb[26].mxu1  ;;  %v1906_v4 = vpop.f32.mrb[26].mxu0 }
 0x75a   :  { %2650 = vtanh.f32 %v1861_v62  ;;  %v1865_v5 = vadd.f32 %v1864_v3, %v1436_v57  ;;  %v1907_v6 = vadd.f32 %v1906_v4, %v1444_v58  ;;  %v1866_v7 = vpop.f32.mrb[27].mxu1  ;;  %v2447_v8 = vpop.f32.mrb[27].mxu0 }
 0x75b   :  { %2652 = vtanh.f32 %v1904_v63  ;;  %v1867_v9 = vadd.f32 %v1866_v7, %v1440_v59 }
 0x75c   :  { %2654 = vtanh.f32 %v1863_v2 }
 0x75d   :  { %2656 = vtanh.f32 %v1865_v5 }
 0x75e   :  { %2658 = vtanh.f32 %v1907_v6 }
 0x75f   :  { %2660 = vtanh.f32 %v1867_v9 }
 0x764   :  { %v2651_v10 = vpop.eup %2650 }
 0x765   :  { %v2653_v11 = vpop.eup %2652 }
 0x766   :  { %v2655_v12 = vpop.eup %2654  ;;  %v2166_v13 = vpack.c.bf16 %v2653_v11, %v2653_v11 }
 0x767   :  { %v2657_v14 = vpop.eup %2656  ;;  %v2165_v15 = vpack.c.bf16 %v2655_v12, %v2651_v10 }
 0x768   :  { %v2659_v16 = vpop.eup %2658  ;;  %1972 = vst.msk [vmem:[#allocation5 + $0x18] sm:$0xf] %vm1971_vm2, %v2166_v13 }
 0x769   :  { %v2661_v17 = vpop.eup %2660  ;;  %1970 = vst [vmem:[#allocation5 + $0x10] sm:$0xff] %v2165_v15  ;;  %v2170_v18 = vpack.c.bf16 %v2659_v16, %v2659_v16 }
 0x76a   :  { %v2169_v19 = vpack.c.bf16 %v2661_v17, %v2657_v14 }
 0x76b   :  { %1976 = vst.msk [vmem:[#allocation5 + $0x34] sm:$0xf] %vm1971_vm2, %v2170_v18 }
 0x76c   :  { %1975 = vst [vmem:[#allocation5 + $0x2c] sm:$0xff] %v2169_v19 }
 0x76d   :  { %2695 = shalt.err (!%p2692_p12)
}
 0x76e   :  { %s2696_s19 = scalar_lea.hbm %s3424_s17, 896 }
 0x76f   :  { %p2697_p13 = scmp.ne.s32.totalorder %s3424_s17, %s2696_s19  ;;  %p2700_p0 = scmp.lt.u32.totalorder %s2696_s19, %s3424_s17 }
 0x771   :  { %p2702_p1 = pnand %p2700_p0, %p2697_p13 }
 0x773   :  { %2705 = shalt.err (!%p2702_p1)
}
 0x774   :  { %s2717_s21 = smov 448   ;;  %s2718_s7 = smov 28  }
 0x775   :  { %1988 = dma.vmem_to_hbm [thread:$0]  %s1983_s16, 896, %s3424_s17, [#allocation4], %s2717_s21, %s2717_s21, %s2718_s7  }
 0x776   :  { %2708 = dma.done.wait [#allocation4], 896  }
 0x777   :  { %2709 = vsyncadd [#allocation4], 4294966400 }
 0x778   :  { %1992 = vsyncpa [#allocation3], 1 }
 0x779   :  { %1993 = vsyncpa [#allocation4], 1 }

// kernel: tpu_custom_call.1
= control target key start
LH: loop header
LB: loop body
LE: loop exit
PB: predicated region body
PF: predicated region fallthrough
CT: control target
= control target key end

     0   :  { %s3407_s0 = inlined_call_operand.vmem [shape: f32[16,784], index: 0, kind: input, shape index: {}]   ;;  %s3408_s1 = inlined_call_operand.vmem [shape: bf16[784,128], index: 1, kind: input, shape index: {}]   ;;  %s3409_s2 = inlined_call_operand.vmem [shape: f32[1,128], index: 2, kind: input, shape index: {}]   ;;  %s3410_s3 = inlined_call_operand.vmem [shape: bf16[128,128], index: 3, kind: input, shape index: {}]   ;;  %s3411_s4 = inlined_call_operand.vmem [shape: f32[1,128], index: 4, kind: input, shape index: {}]   ;;  %s3412_s5 = inlined_call_operand.vmem [shape: bf16[128,128], index: 5, kind: input, shape index: {}]   ;;  %s3413_s6 = inlined_call_operand.vmem [shape: f32[1,128], index: 6, kind: input, shape index: {}]   ;;  %s3414_s7 = inlined_call_operand.vmem [shape: bf16[128,128], index: 7, kind: input, shape index: {}]   ;;  %s3415_s8 = inlined_call_operand.vmem [shape: f32[1,128], index: 8, kind: input, shape index: {}]   ;;  %s3416_s9 = inlined_call_operand.vmem [shape: bf16[128,128], index: 9, kind: input, shape index: {}]   ;;  %s3417_s10 = inlined_call_operand.vmem [shape: f32[1,128], index: 10, kind: input, shape index: {}]   ;;  %s3418_s11 = inlined_call_operand.vmem [shape: bf16[128,128], index: 11, kind: input, shape index: {}]   ;;  %s3419_s12 = inlined_call_operand.vmem [shape: f32[1,128], index: 12, kind: input, shape index: {}]   ;;  %s3420_s13 = inlined_call_operand.hbm [shape: bf16[128,128], index: 13, kind: input, shape index: {}]   ;;  %s3421_s14 = inlined_call_operand.vmem [shape: f32[1,128], index: 14, kind: input, shape index: {}]   ;;  %s3422_s15 = inlined_call_operand.vmem [shape: bf16[128,784], index: 15, kind: input, shape index: {}]   ;;  %s3423_s16 = inlined_call_operand.vmem [shape: f32[1,784], index: 16, kind: input, shape index: {}]   ;;  %s3424_s17 = inlined_call_operand.hbm [shape: bf16[16,784], index: 17, kind: output, shape index: {}]  }
   0x1   :  { %3427 = sst [smem:[#allocation8_spill]] %s3407_s0 }
   0x2   :  { %3428 = sst [smem:[#allocation9_spill]] %s3408_s1 }
   0x3   :  { %22 = vsyncpa [#allocation3], 0 }
   0x4   :  { %23 = vsyncpa [#allocation4], 0  ;;  %s2710_s24 = smov [#allocation2]   ;;  %s2662_s28 = scalar_lea.hbm %s3420_s13, 1024 }
   0x5   :  { %s55_s25 = sshll.u32 %s2710_s24, 4  ;;  %p2663_p0 = scmp.ne.s32.totalorder %s3420_s13, %s2662_s28  ;;  %s56_s25 = int_to_ptr.vmem [resolvable:$true] %s55_s25 }
   0x6   :  { %p2666_p1 = scmp.lt.u32.totalorder %s2662_s28, %s3420_s13 }
   0x8   :  { %p2668_p2 = pnand %p2666_p1, %p2663_p0 }
   0xa   :  { %2671 = shalt.err (!%p2668_p2)
}
   0xb   :  { %s2672_s19 = scalar_lea.vmem %s56_s25, 1024  ;;  %p2677_p4 = scmp.lt.s32.totalorder %s56_s25, %s56_s25 }
   0xc   :  { %p2673_p3 = scmp.ne.s32.totalorder %s56_s25, %s2672_s19  ;;  %p2678_p5 = scmp.lt.s32.totalorder %s2672_s19, %s2672_s19 }
   0xe   :  { %p2679_p6 = por %p2678_p5, %p2677_p4 }
  0x10   :  { %p2680_p7 = pnand %p2679_p6, %p2673_p3 }
  0x12   :  { %2683 = shalt.err (!%p2680_p7)
}
  0x13   :  { %s2711_s1 = smov 64   ;;  %s2712_s20 = smov 4  }
  0x14   :  { %61 = dma.hbm_to_vmem [thread:$0]  %s3420_s13, 1024, %s56_s25, [#allocation3], %s2711_s1, %s2711_s1, %s2712_s20  }
  0x15   :  { %2706 = dma.done.wait [#allocation3], 1024  }
  0x16   :  { %2707 = vsyncadd [#allocation3], 4294966272  ;;  %s3429_s26 = sld [smem:[#allocation9_spill]]  ;;  %s3430_s29 = sld [smem:[#allocation8_spill]]  ;;  %v2713_v43 = vmov 0.0   ;;  %vm2714_vm0 = vmmov 0  }
  0x17   :  { %vm492_vm1 = vcmask 130048   ;;  %vm1971_vm2 = vcmask 125952  }
  0x1c   :  { %v2457_v0 = vld [vmem:[%s3429_s26 + $0x40] sm:$0xff]   ;;  %v2461_v4 = vld [vmem:[%s3429_s26 + $0x48] sm:$0xff]   ;;  %v2465_v8 = vld [vmem:[%s3429_s26 + $0x50] sm:$0xff]  }
  0x1d   :  { %v2458_v1 = vld [vmem:[%s3429_s26] sm:$0xff]   ;;  %2171 = vmatprep.subr.bf16.mxu0 %v2457_v0  ;;  %v2462_v5 = vld [vmem:[%s3429_s26 + $0x8] sm:$0xff]   ;;  %v2466_v9 = vld [vmem:[%s3429_s26 + $0x10] sm:$0xff]  }
  0x1e   :  { %v2459_v2 = vld [vmem:[%s3429_s26 + $0xc0] sm:$0xff]   ;;  %2172 = vmatpush3.bf16.msra.mxu0 %v2458_v1  ;;  %v2463_v6 = vld [vmem:[%s3429_s26 + $0xc8] sm:$0xff]   ;;  %v2467_v10 = vld [vmem:[%s3429_s26 + $0xd0] sm:$0xff]  }
  0x1f   :  { %v2460_v3 = vld [vmem:[%s3429_s26 + $0x80] sm:$0xff]   ;;  %2193 = vmatprep.subr.bf16.mxu1 %v2459_v2  ;;  %2173 = vmatprep.subr.bf16.mxu0 %v2461_v4  ;;  %v2464_v7 = vld [vmem:[%s3429_s26 + $0x88] sm:$0xff]   ;;  %v2468_v11 = vld [vmem:[%s3429_s26 + $0x90] sm:$0xff]  }
  0x20   :  { %2194 = vmatpush3.bf16.msra.mxu1 %v2460_v3  ;;  %v2469_v12 = vld [vmem:[%s3429_s26 + $0x58] sm:$0xff]   ;;  %v2473_v16 = vld [vmem:[%s3429_s26 + $0x60] sm:$0xff]   ;;  %v2477_v20 = vld [vmem:[%s3429_s26 + $0x68] sm:$0xff]  }
  0x21   :  { %2195 = vmatprep.subr.bf16.mxu1 %v2463_v6  ;;  %v2470_v13 = vld [vmem:[%s3429_s26 + $0x18] sm:$0xff]   ;;  %v2474_v17 = vld [vmem:[%s3429_s26 + $0x20] sm:$0xff]   ;;  %v2478_v21 = vld [vmem:[%s3429_s26 + $0x28] sm:$0xff]  }
  0x22   :  { %2174 = vmatpush3.bf16.msra.mxu0 %v2462_v5  ;;  %v2471_v14 = vld [vmem:[%s3429_s26 + $0xd8] sm:$0xff]   ;;  %v2475_v18 = vld [vmem:[%s3429_s26 + $0xe0] sm:$0xff]   ;;  %v2479_v22 = vld [vmem:[%s3429_s26 + $0xe8] sm:$0xff]  }
  0x23   :  { %2175 = vmatprep.subr.bf16.mxu0 %v2465_v8  ;;  %v2472_v15 = vld [vmem:[%s3429_s26 + $0x98] sm:$0xff]   ;;  %v2476_v19 = vld [vmem:[%s3429_s26 + $0xa0] sm:$0xff]   ;;  %v2480_v23 = vld [vmem:[%s3429_s26 + $0xa8] sm:$0xff]  }
  0x24   :  { %2196 = vmatpush3.bf16.msra.mxu1 %v2464_v7  ;;  %v2481_v24 = vld [vmem:[%s3429_s26 + $0x70] sm:$0xff]   ;;  %v2485_v28 = vld [vmem:[%s3429_s26 + $0x78] sm:$0xff]   ;;  %v73_v31 = vld [vmem:[%s3430_s29 + $0x8] sm:$0xff] }
  0x25   :  { %2197 = vmatprep.subr.bf16.mxu1 %v2467_v10  ;;  %v2482_v25 = vld [vmem:[%s3429_s26 + $0x30] sm:$0xff]   ;;  %v2486_v29 = vld [vmem:[%s3429_s26 + $0x38] sm:$0xff]   ;;  %v80_v32 = vld [vmem:[%s3430_s29 + $0x40] sm:$0xff] }
  0x26   :  { %2176 = vmatpush3.bf16.msra.mxu0 %v2466_v9  ;;  %v2483_v26 = vld [vmem:[%s3429_s26 + $0xf0] sm:$0xff]   ;;  %v2487_v30 = vld [vmem:[%s3429_s26 + $0xf8] sm:$0xff]   ;;  %v87_v33 = vpack.c.bf16 %v80_v32, %v73_v31  ;;  %v72_v35 = vld [vmem:[%s3430_s29] sm:$0xff] }
  0x27   :  { %2177 = vmatprep.subr.bf16.mxu0 %v2469_v12  ;;  %v2484_v27 = vld [vmem:[%s3429_s26 + $0xb0] sm:$0xff]   ;;  %v2488_v34 = vld [vmem:[%s3429_s26 + $0xb8] sm:$0xff]   ;;  %v2489_v38 = vld [vmem:[%s3429_s26 + $0x140] sm:$0xff]  }
  0x28   :  { %2198 = vmatpush3.bf16.msra.mxu1 %v2468_v11  ;;  %v79_v36 = vld [vmem:[%s3430_s29 + $0x38] sm:$0xff]  ;;  %528 = vmatprep.mubr.bf16.mxu0 %v87_v33  ;;  %v82_v40 = vld [vmem:[%s3430_s29 + $0x50] sm:$0xff]  ;;  %v2490_v42 = vld [vmem:[%s3429_s26 + $0x100] sm:$0xff]  }
  0x29   :  { %2199 = vmatprep.subr.bf16.mxu1 %v2471_v14  ;;  %v86_v37 = vpack.c.bf16 %v79_v36, %v72_v35  ;;  %v75_v39 = vld [vmem:[%s3430_s29 + $0x18] sm:$0xff]  ;;  %v74_v44 = vld [vmem:[%s3430_s29 + $0x10] sm:$0xff]  ;;  %v81_v45 = vld [vmem:[%s3430_s29 + $0x48] sm:$0xff] }
  0x2a   :  { %2178 = vmatpush3.bf16.msra.mxu0 %v2470_v13  ;;  %v89_v41 = vpack.c.bf16 %v82_v40, %v75_v39  ;;  %v88_v46 = vpack.c.bf16 %v81_v45, %v74_v44  ;;  %v2491_v47 = vld [vmem:[%s3429_s26 + $0x148] sm:$0xff]   ;;  %v2493_v49 = vld [vmem:[%s3429_s26 + $0x150] sm:$0xff]   ;;  %v2495_v51 = vld [vmem:[%s3429_s26 + $0x158] sm:$0xff]  }
  0x2b   :  { %2179 = vmatprep.subr.bf16.mxu0 %v2473_v16  ;;  %v2492_v48 = vld [vmem:[%s3429_s26 + $0x108] sm:$0xff]   ;;  %v2494_v50 = vld [vmem:[%s3429_s26 + $0x110] sm:$0xff]   ;;  %v2496_v52 = vld [vmem:[%s3429_s26 + $0x118] sm:$0xff]  }
  0x2c   :  { %2200 = vmatpush3.bf16.msra.mxu1 %v2472_v15  ;;  %569 = vmatprep.mubr.bf16.mxu1 %v89_v41  ;;  %v2497_v53 = vld [vmem:[%s3429_s26 + $0x160] sm:$0xff]   ;;  %v2499_v55 = vld [vmem:[%s3429_s26 + $0x168] sm:$0xff]   ;;  %v2501_v59 = vld [vmem:[%s3429_s26 + $0x170] sm:$0xff]  }
  0x2d   :  { %2201 = vmatprep.subr.bf16.mxu1 %v2475_v18  ;;  %v2498_v54 = vld [vmem:[%s3429_s26 + $0x120] sm:$0xff]   ;;  %v77_v57 = vld [vmem:[%s3430_s29 + $0x28] sm:$0xff]  ;;  %v78_v62 = vld [vmem:[%s3430_s29 + $0x30] sm:$0xff] }
  0x2e   :  { %2180 = vmatpush3.bf16.msra.mxu0 %v2474_v17  ;;  %v2505_v56 = vld [vmem:[%s3429_s26 + $0x180] sm:$0xff]   ;;  %v2500_v58 = vld [vmem:[%s3429_s26 + $0x128] sm:$0xff]   ;;  %v2502_v1 = vld [vmem:[%s3429_s26 + $0x130] sm:$0xff]  }
  0x2f   :  { %2181 = vmatprep.subr.bf16.mxu0 %v2477_v20  ;;  %v84_v60 = vld [vmem:[%s3430_s29 + $0x60] sm:$0xff]  ;;  %v85_v63 = vld [vmem:[%s3430_s29 + $0x68] sm:$0xff]  ;;  %v2503_v2 = vld [vmem:[%s3429_s26 + $0x178] sm:$0xff]  }
  0x30   :  { %2202 = vmatpush3.bf16.msra.mxu1 %v2476_v19  ;;  %v91_v61 = vpack.c.bf16 %v84_v60, %v77_v57  ;;  %v92_v0 = vpack.c.bf16 %v85_v63, %v78_v62  ;;  %v2504_v3 = vld [vmem:[%s3429_s26 + $0x138] sm:$0xff]   ;;  %v76_v4 = vld [vmem:[%s3430_s29 + $0x20] sm:$0xff]  ;;  %v2507_v8 = vld [vmem:[%s3410_s3 + $0x8] sm:$0xff]  }
  0x31   :  { %2203 = vmatprep.subr.bf16.mxu1 %v2479_v22  ;;  %v83_v5 = vld [vmem:[%s3430_s29 + $0x58] sm:$0xff]  ;;  %v2506_v7 = vld [vmem:[%s3410_s3] sm:$0xff]   ;;  %v2508_v9 = vld [vmem:[%s3410_s3 + $0x10] sm:$0xff]  }
  0x32   :  { %2182 = vmatpush3.bf16.msra.mxu0 %v2478_v21  ;;  %v90_v6 = vpack.c.bf16 %v83_v5, %v76_v4  ;;  %v2509_v10 = vld [vmem:[%s3410_s3 + $0x18] sm:$0xff]   ;;  %v2510_v11 = vld [vmem:[%s3410_s3 + $0x20] sm:$0xff]   ;;  %v2511_v12 = vld [vmem:[%s3410_s3 + $0x28] sm:$0xff]  }
  0x33   :  { %2183 = vmatprep.subr.bf16.mxu0 %v2481_v24  ;;  %v2512_v13 = vld [vmem:[%s3410_s3 + $0x30] sm:$0xff]   ;;  %v2513_v14 = vld [vmem:[%s3410_s3 + $0x38] sm:$0xff]   ;;  %v2514_v15 = vld [vmem:[%s3412_s5] sm:$0xff]  }
  0x34   :  { %2204 = vmatpush3.bf16.msra.mxu1 %v2480_v23  ;;  %v2515_v16 = vld [vmem:[%s3412_s5 + $0x8] sm:$0xff]   ;;  %v2516_v17 = vld [vmem:[%s3412_s5 + $0x10] sm:$0xff]   ;;  %v2517_v18 = vld [vmem:[%s3412_s5 + $0x18] sm:$0xff]  }
  0x35   :  { %2205 = vmatprep.subr.bf16.mxu1 %v2483_v26  ;;  %v2518_v19 = vld [vmem:[%s3412_s5 + $0x20] sm:$0xff]   ;;  %v2519_v20 = vld [vmem:[%s3412_s5 + $0x28] sm:$0xff]   ;;  %v2521_v57 = vld [vmem:[%s3412_s5 + $0x38] sm:$0xff]  }
  0x36   :  { %2184 = vmatpush3.bf16.msra.mxu0 %v2482_v25  ;;  %v1994_v22 = vld [vmem:[%s3409_s2] ss:$0 sm:$0xff]  ;;  %v2524_v60 = vld [vmem:[%s3414_s7 + $0x10] sm:$0xff]   ;;  %v2527_v63 = vld [vmem:[%s3414_s7 + $0x28] sm:$0xff]  }
  0x37   :  { %2185 = vmatprep.subr.bf16.mxu0 %v2485_v28  ;;  %v2526_v62 = vld [vmem:[%s3414_s7 + $0x20] sm:$0xff]  }
  0x38   :  { %2206 = vmatpush3.bf16.msra.mxu1 %v2484_v27 }
  0x39   :  { %2207 = vmatprep.subr.bf16.mxu1 %v2487_v30 }
  0x3a   :  { %2186 = vmatpush3.bf16.msra.mxu0 %v2486_v29 }
  0x3b   :  { %2215 = vmatprep.subr.bf16.mxu0 %v2489_v38 }
  0x3c   :  { %2208 = vmatpush3.bf16.msra.mxu1 %v2488_v34 }
  0x3d   :  { %2302 = vmatprep.subr.bf16.mxu1 %v2713_v43  ;;  %529 = vmatmul.mubr.bf16.vlgmr.msra.gmra.mrb[0].mxu0 %v86_v37 }
  0x3e   :  { %2216 = vmatpush3.bf16.msra.mxu0 %v2490_v42  ;;  %610 = vmatprep.mubr.bf16.mxu0 %v91_v61  ;;  %v2525_v61 = vld [vmem:[%s3414_s7 + $0x18] sm:$0xff]  }
  0x3f   :  { %570 = vmatmul.mubr.bf16.vlgmr.msra.gmra.mrb[0].mxu1 %v88_v46  ;;  %2217 = vmatprep.subr.bf16.mxu0 %v2491_v47 }
  0x40   :  { %2304 = vmatprep.mubr.msk.bf16.mxu1 %vm2714_vm0, %v2713_v43  ;;  %2303 = vmatpush3.bf16.msra.mxu1 %v2505_v56  ;;  %v2520_v56 = vld [vmem:[%s3412_s5 + $0x30] sm:$0xff]  }
  0x41   :  { %2308 = vmatprep.subr.bf16.mxu1 %v2713_v43 }
  0x42   :  { %2218 = vmatpush3.bf16.msra.mxu0 %v2492_v48 }
  0x43   :  { %2219 = vmatprep.subr.bf16.mxu0 %v2493_v49 }
  0x46   :  { %2220 = vmatpush3.bf16.msra.mxu0 %v2494_v50 }
  0x47   :  { %2221 = vmatprep.subr.bf16.mxu0 %v2495_v51  ;;  %2305 = vmatmul.mubr.msk.bf16.vlgmr.msra.gmra.mrb[4].mxu1 %vm492_vm1, %v92_v0  ;;  %v2045_v0 = vld [vmem:[%s3411_s4] ss:$0 sm:$0xff] }
  0x48   :  { %2324 = vmatprep.mubr.msk.bf16.mxu1 %vm2714_vm0, %v2713_v43  ;;  %2309 = vmatpush3.bf16.msra.mxu1 %v2506_v7 }
  0x49   :  { %2310 = vmatprep.subr.bf16.mxu1 %v2713_v43 }
  0x4a   :  { %2222 = vmatpush3.bf16.msra.mxu0 %v2496_v52 }
  0x4b   :  { %2223 = vmatprep.subr.bf16.mxu0 %v2497_v53 }
  0x4c   :  { %2311 = vmatpush3.bf16.msra.mxu1 %v2507_v8 }
  0x4d   :  { %2312 = vmatprep.subr.bf16.mxu1 %v2713_v43 }
  0x4e   :  { %2224 = vmatpush3.bf16.msra.mxu0 %v2498_v54 }
  0x4f   :  { %2225 = vmatprep.subr.bf16.mxu0 %v2499_v55 }
  0x50   :  { %2313 = vmatpush3.bf16.msra.mxu1 %v2508_v9 }
  0x51   :  { %2314 = vmatprep.subr.bf16.mxu1 %v2713_v43 }
  0x52   :  { %2226 = vmatpush3.bf16.msra.mxu0 %v2500_v58  ;;  %v2522_v58 = vld [vmem:[%s3414_s7] sm:$0xff]  }
  0x53   :  { %2227 = vmatprep.subr.bf16.mxu0 %v2501_v59  ;;  %v2523_v59 = vld [vmem:[%s3414_s7 + $0x8] sm:$0xff]  }
  0x54   :  { %2315 = vmatpush3.bf16.msra.mxu1 %v2509_v10  ;;  %v2528_v10 = vld [vmem:[%s3414_s7 + $0x30] sm:$0xff]  }
  0x55   :  { %2316 = vmatprep.subr.bf16.mxu1 %v2713_v43 }
  0x56   :  { %2228 = vmatpush3.bf16.msra.mxu0 %v2502_v1 }
  0x57   :  { %2229 = vmatprep.subr.bf16.mxu0 %v2503_v2 }
  0x58   :  { %2317 = vmatpush3.bf16.msra.mxu1 %v2510_v11  ;;  %v2529_v11 = vld [vmem:[%s3414_s7 + $0x38] sm:$0xff]  }
  0x59   :  { %2318 = vmatprep.subr.bf16.mxu1 %v2713_v43 }
  0x5a   :  { %2230 = vmatpush3.bf16.msra.mxu0 %v2504_v3 }
  0x5b   :  { %2328 = vmatprep.subr.bf16.mxu0 %v2713_v43 }
  0x5c   :  { %2319 = vmatpush3.bf16.msra.mxu1 %v2511_v12  ;;  %v2530_v12 = vld [vmem:[%s3416_s9] sm:$0xff]  }
  0x5d   :  { %611 = vmatmul.mubr.bf16.vlgmr.msra.gmra.mrb[4].mxu0 %v90_v6  ;;  %2320 = vmatprep.subr.bf16.mxu1 %v2713_v43 }
  0x5e   :  { %2344 = vmatprep.mubr.msk.bf16.mxu0 %vm2714_vm0, %v2713_v43  ;;  %2329 = vmatpush3.bf16.msra.mxu0 %v2514_v15  ;;  %v2533_v15 = vld [vmem:[%s3416_s9 + $0x18] sm:$0xff]  }
  0x5f   :  { %2330 = vmatprep.subr.bf16.mxu0 %v2713_v43 }
  0x60   :  { %2321 = vmatpush3.bf16.msra.mxu1 %v2512_v13  ;;  %v2531_v13 = vld [vmem:[%s3416_s9 + $0x8] sm:$0xff]  }
  0x61   :  { %2322 = vmatprep.subr.bf16.mxu1 %v2713_v43 }
  0x62   :  { %2331 = vmatpush3.bf16.msra.mxu0 %v2515_v16  ;;  %v2534_v16 = vld [vmem:[%s3416_s9 + $0x20] sm:$0xff]  }
  0x63   :  { %2332 = vmatprep.subr.bf16.mxu0 %v2713_v43 }
  0x64   :  { %2323 = vmatpush3.bf16.msra.mxu1 %v2513_v14  ;;  %v2532_v14 = vld [vmem:[%s3416_s9 + $0x10] sm:$0xff]  }
  0x65   :  { %2348 = vmatprep.subr.bf16.mxu1 %v2713_v43 }
  0x66   :  { %2333 = vmatpush3.bf16.msra.mxu0 %v2516_v17  ;;  %v2535_v17 = vld [vmem:[%s3416_s9 + $0x28] sm:$0xff]  }
  0x67   :  { %2334 = vmatprep.subr.bf16.mxu0 %v2713_v43 }
  0x6a   :  { %2335 = vmatpush3.bf16.msra.mxu0 %v2517_v18  ;;  %v2054_v18 = vld [vmem:[%s3413_s6] ss:$0 sm:$0xff] }
  0x6b   :  { %2336 = vmatprep.subr.bf16.mxu0 %v2713_v43 }
  0x6e   :  { %2337 = vmatpush3.bf16.msra.mxu0 %v2518_v19 }
  0x6f   :  { %2338 = vmatprep.subr.bf16.mxu0 %v2713_v43 }
  0x72   :  { %2339 = vmatpush3.bf16.msra.mxu0 %v2519_v20 }
  0x73   :  { %2340 = vmatprep.subr.bf16.mxu0 %v2713_v43 }
  0x76   :  { %2341 = vmatpush3.bf16.msra.mxu0 %v2520_v56 }
  0x77   :  { %2342 = vmatprep.subr.bf16.mxu0 %v2713_v43 }
  0x7a   :  { %2343 = vmatpush3.bf16.msra.mxu0 %v2521_v57 }
  0x7b   :  { %2368 = vmatprep.subr.bf16.mxu0 %v2713_v43 }
 0x110   :  { %v2187_v21 = vpop.f32.mrb[0].mxu0 }
 0x111   :  { %v2188_v23 = vpop.f32.mrb[1].mxu0 }
 0x112   :  { %v2189_v24 = vadd.f32 %v2188_v23, %v2187_v21  ;;  %v2190_v25 = vpop.f32.mrb[2].mxu0  ;;  %v2209_v26 = vpop.f32.mrb[0].mxu1 }
 0x113   :  { %v2191_v27 = vpop.f32.mrb[3].mxu0  ;;  %v2210_v30 = vpop.f32.mrb[1].mxu1 }
 0x114   :  { %v531_v28 = vadd.f32 %v2189_v24, %v1994_v22  ;;  %v2192_v29 = vadd.f32 %v2191_v27, %v2190_v25  ;;  %v2211_v31 = vadd.f32 %v2210_v30, %v2209_v26  ;;  %v2212_v32 = vpop.f32.mrb[2].mxu1  ;;  %v2538_v30 = vld [vmem:[%s3418_s11] sm:$0xff]  }
 0x115   :  { %v2213_v34 = vpop.f32.mrb[3].mxu1 }
 0x116   :  { %v534_v33 = vadd.f32 %v2192_v29, %v1994_v22  ;;  %v572_v35 = vadd.f32 %v2211_v31, %v531_v28  ;;  %v2214_v36 = vadd.f32 %v2213_v34, %v2212_v32  ;;  %v2536_v28 = vld [vmem:[%s3416_s9 + $0x30] sm:$0xff]   ;;  %v2537_v29 = vld [vmem:[%s3416_s9 + $0x38] sm:$0xff]   ;;  %v2539_v31 = vld [vmem:[%s3418_s11 + $0x8] sm:$0xff]  }
 0x117   :  { %v2540_v32 = vld [vmem:[%s3418_s11 + $0x10] sm:$0xff]   ;;  %v2542_v34 = vld [vmem:[%s3418_s11 + $0x20] sm:$0xff]  }
 0x118   :  { %v575_v37 = vadd.f32 %v2214_v36, %v534_v33  ;;  %v2541_v33 = vld [vmem:[%s3418_s11 + $0x18] sm:$0xff]   ;;  %v2063_v36 = vld [vmem:[%s3415_s8] ss:$0 sm:$0xff] }
 0x11a   :  { %v653_v38 = vpop.f32.mrb[4].mxu1 }
 0x11b   :  { %v2306_v39 = vpop.f32.mrb[5].mxu1 }
 0x11c   :  { %v656_v40 = vpop.f32.mrb[6].mxu1 }
 0x11d   :  { %v2307_v41 = vpop.f32.mrb[7].mxu1 }
 0x130   :  { %v2231_v42 = vpop.f32.mrb[4].mxu0 }
 0x131   :  { %v2232_v44 = vpop.f32.mrb[5].mxu0 }
 0x132   :  { %v2233_v45 = vadd.f32 %v2232_v44, %v2231_v42  ;;  %v2234_v46 = vpop.f32.mrb[6].mxu0 }
 0x133   :  { %v2235_v47 = vpop.f32.mrb[7].mxu0 }
 0x134   :  { %v613_v48 = vadd.f32 %v2233_v45, %v572_v35  ;;  %v2236_v49 = vadd.f32 %v2235_v47, %v2234_v46  ;;  %v2543_v35 = vld [vmem:[%s3418_s11 + $0x28] sm:$0xff]   ;;  %v2544_v45 = vld [vmem:[%s3418_s11 + $0x30] sm:$0xff]   ;;  %v2545_v46 = vld [vmem:[%s3418_s11 + $0x38] sm:$0xff]  }
 0x135   :  { %v2546_v47 = vld [vmem:[#allocation2] sm:$0xff]  }
 0x136   :  { %v654_v50 = vadd.f32 %v653_v38, %v613_v48  ;;  %v616_v51 = vadd.f32 %v2236_v49, %v575_v37  ;;  %v2547_v48 = vld [vmem:[#allocation2 + $0x8] sm:$0xff]   ;;  %v2548_v49 = vld [vmem:[#allocation2 + $0x10] sm:$0xff]  }
 0x138   :  { %v657_v52 = vadd.f32 %v656_v40, %v616_v51  ;;  %v660_v53 = vmax.f32 %v654_v50, 0.0  ;;  %v2549_v50 = vld [vmem:[#allocation2 + $0x18] sm:$0xff]   ;;  %v2550_v51 = vld [vmem:[#allocation2 + $0x20] sm:$0xff]  }
 0x13a   :  { %v661_v54 = vmax.f32 %v657_v52, 0.0  ;;  %v2551_v52 = vld [vmem:[#allocation2 + $0x28] sm:$0xff]  }
 0x13c   :  { %v662_v55 = vpack.c.bf16 %v661_v54, %v660_v53  ;;  %v2072_v53 = vld [vmem:[%s3417_s10] ss:$0 sm:$0xff] }
 0x13e   :  { %2325 = vmatmul.mubr.bf16.vlgmr.msra.gmra.mrb[8].mxu1 %v662_v55 }
 0x13f   :  { %2364 = vmatprep.mubr.msk.bf16.mxu1 %vm2714_vm0, %v2713_v43  ;;  %2349 = vmatpush3.bf16.msra.mxu1 %v2522_v58 }
 0x140   :  { %2350 = vmatprep.subr.bf16.mxu1 %v2713_v43 }
 0x143   :  { %2351 = vmatpush3.bf16.msra.mxu1 %v2523_v59 }
 0x144   :  { %2352 = vmatprep.subr.bf16.mxu1 %v2713_v43 }
 0x147   :  { %2353 = vmatpush3.bf16.msra.mxu1 %v2524_v60 }
 0x148   :  { %2354 = vmatprep.subr.bf16.mxu1 %v2713_v43 }
 0x14b   :  { %2355 = vmatpush3.bf16.msra.mxu1 %v2525_v61 }
 0x14c   :  { %2356 = vmatprep.subr.bf16.mxu1 %v2713_v43 }
 0x14f   :  { %2357 = vmatpush3.bf16.msra.mxu1 %v2526_v62 }
 0x150   :  { %2358 = vmatprep.subr.bf16.mxu1 %v2713_v43 }
 0x153   :  { %2359 = vmatpush3.bf16.msra.mxu1 %v2527_v63  ;;  %v2552_v63 = vld [vmem:[#allocation2 + $0x30] sm:$0xff]  }
 0x154   :  { %2360 = vmatprep.subr.bf16.mxu1 %v2713_v43 }
 0x157   :  { %2361 = vmatpush3.bf16.msra.mxu1 %v2528_v10  ;;  %v2580_v10 = vld [vmem:[%s3422_s15 + $0xe4] ss:$28 sps:$4 sm:$0xff]  }
 0x158   :  { %2362 = vmatprep.subr.bf16.mxu1 %v2713_v43 }
 0x15b   :  { %2363 = vmatpush3.bf16.msra.mxu1 %v2529_v11  ;;  %v2578_v11 = vld [vmem:[%s3422_s15 + $0xe0] ss:$28 sps:$4 sm:$0xff]  }
 0x15c   :  { %2388 = vmatprep.subr.bf16.mxu1 %v2713_v43 }
 0x211   :  { %v768_v1 = vpop.f32.mrb[8].mxu1 }
 0x212   :  { %v769_v2 = vadd.f32 %v2045_v0, %v768_v1  ;;  %v2326_v3 = vpop.f32.mrb[9].mxu1  ;;  %v2554_v1 = vld [vmem:[%s3422_s15] ss:$28 sps:$4 sm:$0xff]  }
 0x213   :  { %v771_v4 = vpop.f32.mrb[10].mxu1  ;;  %v2559_v3 = vld [vmem:[%s3422_s15 + $0xc] ss:$28 sps:$4 sm:$0xff]  }
 0x214   :  { %v772_v5 = vadd.f32 %v2045_v0, %v771_v4  ;;  %v2327_v6 = vpop.f32.mrb[11].mxu1  ;;  %v775_v7 = vmax.f32 %v769_v2, 0.0  ;;  %v2553_v0 = vld [vmem:[#allocation2 + $0x38] sm:$0xff]   ;;  %v2556_v2 = vld [vmem:[%s3422_s15 + $0x4] ss:$28 sps:$4 sm:$0xff]  }
 0x215   :  { %v2562_v4 = vld [vmem:[%s3422_s15 + $0x3c] ss:$28 sps:$4 sm:$0xff]   ;;  %v2568_v6 = vld [vmem:[%s3422_s15 + $0x74] ss:$28 sps:$4 sm:$0xff]  }
 0x216   :  { %v776_v8 = vmax.f32 %v772_v5, 0.0  ;;  %v2560_v5 = vld [vmem:[%s3422_s15 + $0x38] ss:$28 sps:$4 sm:$0xff]  }
 0x218   :  { %v777_v9 = vpack.c.bf16 %v776_v8, %v775_v7  ;;  %v2566_v7 = vld [vmem:[%s3422_s15 + $0x70] ss:$28 sps:$4 sm:$0xff]  }
 0x219   :  { %v2574_v8 = vld [vmem:[%s3422_s15 + $0xac] ss:$28 sps:$4 sm:$0xff]  }
 0x21a   :  { %2345 = vmatmul.mubr.bf16.vlgmr.msra.gmra.mrb[8].mxu0 %v777_v9  ;;  %v2572_v9 = vld [vmem:[%s3422_s15 + $0xa8] ss:$28 sps:$4 sm:$0xff]  }
 0x21b   :  { %2384 = vmatprep.mubr.msk.bf16.mxu0 %vm2714_vm0, %v2713_v43  ;;  %2369 = vmatpush3.bf16.msra.mxu0 %v2530_v12  ;;  %v2586_v12 = vld [vmem:[%s3422_s15 + $0x11c] ss:$28 sps:$4 sm:$0xff]  }
 0x21c   :  { %2370 = vmatprep.subr.bf16.mxu0 %v2713_v43 }
 0x21f   :  { %2371 = vmatpush3.bf16.msra.mxu0 %v2531_v13  ;;  %v2584_v13 = vld [vmem:[%s3422_s15 + $0x118] ss:$28 sps:$4 sm:$0xff]  }
 0x220   :  { %2372 = vmatprep.subr.bf16.mxu0 %v2713_v43 }
 0x223   :  { %2373 = vmatpush3.bf16.msra.mxu0 %v2532_v14  ;;  %v2081_v14 = vld [vmem:[%s3419_s12] ss:$0 sm:$0xff] }
 0x224   :  { %2374 = vmatprep.subr.bf16.mxu0 %v2713_v43 }
 0x227   :  { %2375 = vmatpush3.bf16.msra.mxu0 %v2533_v15 }
 0x228   :  { %2376 = vmatprep.subr.bf16.mxu0 %v2713_v43 }
 0x22b   :  { %2377 = vmatpush3.bf16.msra.mxu0 %v2534_v16 }
 0x22c   :  { %2378 = vmatprep.subr.bf16.mxu0 %v2713_v43 }
 0x22f   :  { %2379 = vmatpush3.bf16.msra.mxu0 %v2535_v17 }
 0x230   :  { %2380 = vmatprep.subr.bf16.mxu0 %v2713_v43 }
 0x233   :  { %2381 = vmatpush3.bf16.msra.mxu0 %v2536_v28  ;;  %v2569_v28 = vld [vmem:[%s3422_s15 + $0x78] ss:$28 sps:$4 sm:$0xff]  }
 0x234   :  { %2382 = vmatprep.subr.bf16.mxu0 %v2713_v43 }
 0x237   :  { %2383 = vmatpush3.bf16.msra.mxu0 %v2537_v29  ;;  %v2577_v29 = vld [vmem:[%s3422_s15 + $0xb4] ss:$28 sps:$4 sm:$0xff]  }
 0x238   :  { %2408 = vmatprep.subr.bf16.mxu0 %v2713_v43 }
 0x2ed   :  { %v883_v19 = vpop.f32.mrb[8].mxu0 }
 0x2ee   :  { %v884_v20 = vadd.f32 %v2054_v18, %v883_v19  ;;  %v2346_v21 = vpop.f32.mrb[9].mxu0 }
 0x2ef   :  { %v886_v22 = vpop.f32.mrb[10].mxu0 }
 0x2f0   :  { %v887_v23 = vadd.f32 %v2054_v18, %v886_v22  ;;  %v2347_v24 = vpop.f32.mrb[11].mxu0  ;;  %v890_v25 = vmax.f32 %v884_v20, 0.0 }
 0x2f2   :  { %v891_v26 = vmax.f32 %v887_v23, 0.0  ;;  %v2557_v23 = vld [vmem:[%s3422_s15 + $0x8] ss:$28 sps:$4 sm:$0xff]  }
 0x2f4   :  { %v892_v27 = vpack.c.bf16 %v891_v26, %v890_v25  ;;  %v2565_v25 = vld [vmem:[%s3422_s15 + $0x44] ss:$28 sps:$4 sm:$0xff]  }
 0x2f5   :  { %v2563_v26 = vld [vmem:[%s3422_s15 + $0x40] ss:$28 sps:$4 sm:$0xff]  }
 0x2f6   :  { %2365 = vmatmul.mubr.bf16.vlgmr.msra.gmra.mrb[12].mxu1 %v892_v27  ;;  %v2571_v27 = vld [vmem:[%s3422_s15 + $0x7c] ss:$28 sps:$4 sm:$0xff]  }
 0x2f7   :  { %2404 = vmatprep.mubr.msk.bf16.mxu1 %vm2714_vm0, %v2713_v43  ;;  %2389 = vmatpush3.bf16.msra.mxu1 %v2538_v30  ;;  %v2575_v30 = vld [vmem:[%s3422_s15 + $0xb0] ss:$28 sps:$4 sm:$0xff]  }
 0x2f8   :  { %2390 = vmatprep.subr.bf16.mxu1 %v2713_v43 }
 0x2fb   :  { %2391 = vmatpush3.bf16.msra.mxu1 %v2539_v31  ;;  %v2583_v31 = vld [vmem:[%s3422_s15 + $0xec] ss:$28 sps:$4 sm:$0xff]  }
 0x2fc   :  { %2392 = vmatprep.subr.bf16.mxu1 %v2713_v43 }
 0x2ff   :  { %2393 = vmatpush3.bf16.msra.mxu1 %v2540_v32  ;;  %v2581_v32 = vld [vmem:[%s3422_s15 + $0xe8] ss:$28 sps:$4 sm:$0xff]  }
 0x300   :  { %2394 = vmatprep.subr.bf16.mxu1 %v2713_v43 }
 0x303   :  { %2395 = vmatpush3.bf16.msra.mxu1 %v2541_v33  ;;  %v2589_v33 = vld [vmem:[%s3422_s15 + $0x124] ss:$28 sps:$4 sm:$0xff]  }
 0x304   :  { %2396 = vmatprep.subr.bf16.mxu1 %v2713_v43 }
 0x307   :  { %2397 = vmatpush3.bf16.msra.mxu1 %v2542_v34  ;;  %v2587_v34 = vld [vmem:[%s3422_s15 + $0x120] ss:$28 sps:$4 sm:$0xff]  }
 0x308   :  { %2398 = vmatprep.subr.bf16.mxu1 %v2713_v43 }
 0x30b   :  { %2399 = vmatpush3.bf16.msra.mxu1 %v2543_v35  ;;  %v2592_v35 = vld [vmem:[%s3422_s15 + $0x154] ss:$28 sps:$4 sm:$0xff]  }
 0x30c   :  { %2400 = vmatprep.subr.bf16.mxu1 %v2713_v43 }
 0x30f   :  { %2401 = vmatpush3.bf16.msra.mxu1 %v2544_v45  ;;  %v2715_v45 = vmov 0  }
 0x310   :  { %2402 = vmatprep.subr.bf16.mxu1 %v2713_v43 }
 0x313   :  { %2403 = vmatpush3.bf16.msra.mxu1 %v2545_v46  ;;  %v2090_v46 = vld [vmem:[%s3421_s14] ss:$0 sm:$0xff] }
 0x314   :  { %1740 = vmatprep.subr.bf16.mxu1 %v2556_v2  ;;  %v2617_v2 = vld [vmem:[%s3422_s15 + $0xc0] ss:$28 sps:$4 sm:$0xff]  }
 0x3c9   :  { %v998_v37 = vpop.f32.mrb[12].mxu1 }
 0x3ca   :  { %v2366_v38 = vpop.f32.mrb[13].mxu1  ;;  %v999_v40 = vadd.f32 %v2063_v36, %v998_v37  ;;  %v2590_v37 = vld [vmem:[%s3422_s15 + $0x150] ss:$28 sps:$4 sm:$0xff]  }
 0x3cb   :  { %v1001_v39 = vpop.f32.mrb[14].mxu1  ;;  %v2593_v38 = vld [vmem:[%s3422_s15 + $0x158] ss:$28 sps:$4 sm:$0xff]  }
 0x3cc   :  { %v1002_v41 = vadd.f32 %v2063_v36, %v1001_v39  ;;  %v2367_v42 = vpop.f32.mrb[15].mxu1  ;;  %v2595_v36 = vld [vmem:[%s3422_s15 + $0x15c] ss:$28 sps:$4 sm:$0xff]   ;;  %v2598_v39 = vld [vmem:[%s3422_s15 + $0x18c] ss:$28 sps:$4 sm:$0xff]  }
 0x3cd   :  { %v2599_v42 = vld [vmem:[%s3422_s15 + $0x190] ss:$28 sps:$4 sm:$0xff]  }
 0x3ce   :  { %v1005_v44 = vpack.c.bf16 %v1002_v41, %v999_v40  ;;  %v2601_v40 = vld [vmem:[%s3422_s15 + $0x194] ss:$28 sps:$4 sm:$0xff]   ;;  %v2596_v41 = vld [vmem:[%s3422_s15 + $0x188] ss:$28 sps:$4 sm:$0xff]  }
 0x3d0   :  { %2385 = vmatmul.mubr.bf16.vlgmr.msra.gmra.mrb[12].mxu0 %v1005_v44  ;;  %v2604_v44 = vld [vmem:[%s3422_s15 + $0x14] ss:$28 sps:$4 sm:$0xff]  }
 0x3d1   :  { %2424 = vmatprep.mubr.msk.bf16.mxu0 %vm2714_vm0, %v2713_v43  ;;  %2409 = vmatpush3.bf16.msra.mxu0 %v2546_v47 }
 0x3d2   :  { %2410 = vmatprep.subr.bf16.mxu0 %v2713_v43 }
 0x3d5   :  { %2411 = vmatpush3.bf16.msra.mxu0 %v2547_v48 }
 0x3d6   :  { %2412 = vmatprep.subr.bf16.mxu0 %v2713_v43 }
 0x3d9   :  { %2413 = vmatpush3.bf16.msra.mxu0 %v2548_v49 }
 0x3da   :  { %2414 = vmatprep.subr.bf16.mxu0 %v2713_v43 }
 0x3dd   :  { %2415 = vmatpush3.bf16.msra.mxu0 %v2549_v50 }
 0x3de   :  { %2416 = vmatprep.subr.bf16.mxu0 %v2713_v43 }
 0x3e1   :  { %2417 = vmatpush3.bf16.msra.mxu0 %v2550_v51 }
 0x3e2   :  { %2418 = vmatprep.subr.bf16.mxu0 %v2713_v43 }
 0x3e5   :  { %2419 = vmatpush3.bf16.msra.mxu0 %v2551_v52 }
 0x3e6   :  { %2420 = vmatprep.subr.bf16.mxu0 %v2713_v43 }
 0x3e9   :  { %2421 = vmatpush3.bf16.msra.mxu0 %v2552_v63  ;;  %v2613_v63 = vld [vmem:[%s3422_s15 + $0x88] ss:$28 sps:$4 sm:$0xff]  }
 0x3ea   :  { %2422 = vmatprep.subr.bf16.mxu0 %v2713_v43 }
 0x3ed   :  { %2423 = vmatpush3.bf16.msra.mxu0 %v2553_v0  ;;  %v2616_v0 = vld [vmem:[%s3422_s15 + $0xbc] ss:$28 sps:$4 sm:$0xff]  }
 0x3ee   :  { %1783 = vmatprep.subr.bf16.mxu0 %v2559_v3  ;;  %v2620_v3 = vld [vmem:[%s3422_s15 + $0xf4] ss:$28 sps:$4 sm:$0xff]  }
 0x4a3   :  { %v1111_v54 = vpop.f32.mrb[12].mxu0 }
 0x4a4   :  { %v1112_v55 = vadd.f32 %v2072_v53, %v1111_v54  ;;  %v2386_v56 = vpop.f32.mrb[13].mxu0 }
 0x4a5   :  { %v1114_v57 = vpop.f32.mrb[14].mxu0  ;;  %v2605_v56 = vld [vmem:[%s3422_s15 + $0x18] ss:$28 sps:$4 sm:$0xff]  }
 0x4a6   :  { %v1115_v58 = vadd.f32 %v2072_v53, %v1114_v57  ;;  %v2387_v59 = vpop.f32.mrb[15].mxu0  ;;  %v1118_v60 = vmax.f32 %v1112_v55, 0.0  ;;  %v2602_v55 = vld [vmem:[%s3422_s15 + $0x10] ss:$28 sps:$4 sm:$0xff]  }
 0x4a7   :  { %v2606_v59 = vld [vmem:[%s3422_s15 + $0x48] ss:$28 sps:$4 sm:$0xff]  }
 0x4a8   :  { %v1119_v61 = vmax.f32 %v1115_v58, 0.0  ;;  %v2608_v58 = vld [vmem:[%s3422_s15 + $0x4c] ss:$28 sps:$4 sm:$0xff]  }
 0x4aa   :  { %v1120_v62 = vpack.c.bf16 %v1119_v61, %v1118_v60  ;;  %v2609_v60 = vld [vmem:[%s3422_s15 + $0x50] ss:$28 sps:$4 sm:$0xff]   ;;  %v2612_v61 = vld [vmem:[%s3422_s15 + $0x84] ss:$28 sps:$4 sm:$0xff]  }
 0x4ac   :  { %2405 = vmatmul.mubr.bf16.vlgmr.msra.gmra.mrb[16].mxu1 %v1120_v62  ;;  %v2610_v62 = vld [vmem:[%s3422_s15 + $0x80] ss:$28 sps:$4 sm:$0xff]  }
 0x4ad   :  { %1741 = vmatpush1.bf16.msra.mxu1 %v2554_v1  ;;  %1772 = vmatprep.mubr.bf16.mxu1 %v2715_v45  ;;  %v2614_v1 = vld [vmem:[%s3422_s15 + $0xb8] ss:$28 sps:$4 sm:$0xff]  }
 0x4ae   :  { %1742 = vmatprep.subr.bf16.mxu1 %v2562_v4  ;;  %v2618_v4 = vld [vmem:[%s3422_s15 + $0xf0] ss:$28 sps:$4 sm:$0xff]  }
 0x4b1   :  { %1743 = vmatpush1.bf16.msra.mxu1 %v2560_v5  ;;  %v2621_v5 = vld [vmem:[%s3422_s15 + $0xf8] ss:$28 sps:$4 sm:$0xff]  }
 0x4b2   :  { %1744 = vmatprep.subr.bf16.mxu1 %v2568_v6  ;;  %v2624_v6 = vld [vmem:[%s3422_s15 + $0x12c] ss:$28 sps:$4 sm:$0xff]  }
 0x4b5   :  { %1745 = vmatpush1.bf16.msra.mxu1 %v2566_v7  ;;  %v2622_v7 = vld [vmem:[%s3422_s15 + $0x128] ss:$28 sps:$4 sm:$0xff]  }
 0x4b6   :  { %1746 = vmatprep.subr.bf16.mxu1 %v2574_v8  ;;  %v2625_v8 = vld [vmem:[%s3422_s15 + $0x130] ss:$28 sps:$4 sm:$0xff]  }
 0x4b9   :  { %1747 = vmatpush1.bf16.msra.mxu1 %v2572_v9  ;;  %v2628_v9 = vld [vmem:[%s3422_s15 + $0x164] ss:$28 sps:$4 sm:$0xff]  }
 0x4ba   :  { %1748 = vmatprep.subr.bf16.mxu1 %v2580_v10  ;;  %v2626_v10 = vld [vmem:[%s3422_s15 + $0x160] ss:$28 sps:$4 sm:$0xff]  }
 0x4bd   :  { %1749 = vmatpush1.bf16.msra.mxu1 %v2578_v11  ;;  %v2629_v11 = vld [vmem:[%s3422_s15 + $0x168] ss:$28 sps:$4 sm:$0xff]  }
 0x4be   :  { %1750 = vmatprep.subr.bf16.mxu1 %v2586_v12  ;;  %v2632_v12 = vld [vmem:[%s3422_s15 + $0x19c] ss:$28 sps:$4 sm:$0xff]  }
 0x4c1   :  { %1751 = vmatpush1.bf16.msra.mxu1 %v2584_v13  ;;  %v2630_v13 = vld [vmem:[%s3422_s15 + $0x198] ss:$28 sps:$4 sm:$0xff]  }
 0x4c2   :  { %1752 = vmatprep.subr.bf16.mxu1 %v2592_v35 }
 0x4c5   :  { %1753 = vmatpush1.bf16.msra.mxu1 %v2590_v37 }
 0x4c6   :  { %1754 = vmatprep.subr.bf16.mxu1 %v2598_v39 }
 0x4c9   :  { %1755 = vmatpush1.bf16.msra.mxu1 %v2596_v41 }
 0x4ca   :  { %1826 = vmatprep.subr.bf16.mxu1 %v2604_v44 }
 0x57f   :  { %v1226_v15 = vpop.f32.mrb[16].mxu1 }
 0x580   :  { %v1227_v16 = vadd.f32 %v2081_v14, %v1226_v15  ;;  %v2406_v17 = vpop.f32.mrb[17].mxu1  ;;  %v1417_v15 = vlaneseq }
 0x581   :  { %v1229_v18 = vpop.f32.mrb[18].mxu1 }
 0x582   :  { %v1230_v19 = vadd.f32 %v2081_v14, %v1229_v18  ;;  %v2407_v20 = vpop.f32.mrb[19].mxu1  ;;  %v1233_v21 = vmax.f32 %v1227_v16, 0.0  ;;  %v2633_v14 = vld [vmem:[%s3422_s15 + $0x1a0] ss:$28 sps:$4 sm:$0xff]   ;;  %v1418_v16 = vshrl.u32 %v1417_v15, 7  ;;  %s2716_s15 = smov [#allocation5]  }
 0x584   :  { %v1234_v22 = vmax.f32 %v1230_v19, 0.0  ;;  %v1419_v17 = vsub.s32 0, %v1418_v16  ;;  %v1427_v18 = vsub.s32 2, %v1418_v16  ;;  %v1415_v19 = vld [vmem:[%s3423_s16] sm:$0x7f]  ;;  %v1423_v20 = vsub.s32 1, %v1418_v16 }
 0x585   :  { %s1982_s16 = sshll.u32 %s2716_s15, 4  ;;  %s1983_s16 = int_to_ptr.vmem [resolvable:$true] %s1982_s16 }
 0x586   :  { %v1235_v24 = vpack.c.bf16 %v1234_v22, %v1233_v21  ;;  %v1431_v21 = vsub.s32 3, %v1418_v16  ;;  %v1420_v22 = vrot.slane %v1415_v19, %v1419_v17  ;;  %s2684_s4 = scalar_lea.vmem %s1983_s16, 896  ;;  %p2689_p9 = scmp.lt.s32.totalorder %s1983_s16, %s1983_s16 }
 0x587   :  { %p2685_p8 = scmp.ne.s32.totalorder %s1983_s16, %s2684_s4  ;;  %p2690_p10 = scmp.lt.s32.totalorder %s2684_s4, %s2684_s4 }
 0x588   :  { %2425 = vmatmul.mubr.bf16.vlgmr.msra.gmra.mrb[16].mxu0 %v1235_v24  ;;  %v1424_v24 = vrot.slane %v1415_v19, %v1423_v20 }
 0x589   :  { %1784 = vmatpush1.bf16.msra.mxu0 %v2557_v23  ;;  %1815 = vmatprep.mubr.bf16.mxu0 %v2715_v45  ;;  %v1428_v23 = vrot.slane %v1415_v19, %v1427_v18  ;;  %p2691_p11 = por %p2690_p10, %p2689_p9 }
 0x58a   :  { %1785 = vmatprep.subr.bf16.mxu0 %v2565_v25  ;;  %v1432_v25 = vrot.slane %v1415_v19, %v1431_v21 }
 0x58b   :  { %p2692_p12 = pnand %p2691_p11, %p2685_p8 }
 0x58d   :  { %1786 = vmatpush1.bf16.msra.mxu0 %v2563_v26 }
 0x58e   :  { %1787 = vmatprep.subr.bf16.mxu0 %v2571_v27 }
 0x591   :  { %1788 = vmatpush1.bf16.msra.mxu0 %v2569_v28 }
 0x592   :  { %1789 = vmatprep.subr.bf16.mxu0 %v2577_v29 }
 0x595   :  { %1790 = vmatpush1.bf16.msra.mxu0 %v2575_v30 }
 0x596   :  { %1791 = vmatprep.subr.bf16.mxu0 %v2583_v31 }
 0x599   :  { %1792 = vmatpush1.bf16.msra.mxu0 %v2581_v32 }
 0x59a   :  { %1793 = vmatprep.subr.bf16.mxu0 %v2589_v33 }
 0x59d   :  { %1794 = vmatpush1.bf16.msra.mxu0 %v2587_v34 }
 0x59e   :  { %1795 = vmatprep.subr.bf16.mxu0 %v2595_v36 }
 0x5a1   :  { %1796 = vmatpush1.bf16.msra.mxu0 %v2593_v38 }
 0x5a2   :  { %1797 = vmatprep.subr.bf16.mxu0 %v2601_v40 }
 0x5a5   :  { %1798 = vmatpush1.bf16.msra.mxu0 %v2599_v42 }
 0x5a6   :  { %2428 = vmatprep.subr.bf16.mxu0 %v2713_v43 }
 0x65b   :  { %v1341_v47 = vpop.f32.mrb[16].mxu0 }
 0x65c   :  { %v1342_v48 = vadd.f32 %v2090_v46, %v1341_v47  ;;  %v2426_v49 = vpop.f32.mrb[17].mxu0 }
 0x65d   :  { %v1344_v50 = vpop.f32.mrb[18].mxu0 }
 0x65e   :  { %v1345_v51 = vadd.f32 %v2090_v46, %v1344_v50  ;;  %v2427_v52 = vpop.f32.mrb[19].mxu0  ;;  %v1348_v53 = vmax.f32 %v1342_v48, 0.0 }
 0x660   :  { %v1349_v54 = vmax.f32 %v1345_v51, 0.0 }
 0x662   :  { %v1350_v57 = vpack.c.bf16 %v1349_v54, %v1348_v53  ;;  %v1435_v54 = vsub.s32 4, %v1418_v16 }
 0x664   :  { %1773 = vmatmul.mubr.bf16.vlgmr.msra.gmra.mrb[20].mxu1 %v1350_v57  ;;  %1816 = vmatmul.mubr.bf16.vlgmr.msra.gmra.mrb[20].mxu0 %v1350_v57 }
 0x665   :  { %1827 = vmatpush1.bf16.msra.mxu1 %v2602_v55  ;;  %2429 = vmatpush3.bf16.msra.mxu0 %v2605_v56  ;;  %v1443_v55 = vsub.s32 6, %v1418_v16  ;;  %v1439_v56 = vsub.s32 5, %v1418_v16 }
 0x666   :  { %1828 = vmatprep.subr.bf16.mxu1 %v2608_v58  ;;  %2430 = vmatprep.subr.bf16.mxu0 %v2713_v43 }
 0x667   :  { %1858 = vmatprep.mubr.bf16.mxu1 %v2715_v45  ;;  %2444 = vmatprep.mubr.msk.bf16.mxu0 %vm2714_vm0, %v2713_v43  ;;  %v1444_v58 = vrot.slane %v1415_v19, %v1443_v55 }
 0x669   :  { %1829 = vmatpush1.bf16.msra.mxu1 %v2606_v59  ;;  %2431 = vmatpush3.bf16.msra.mxu0 %v2609_v60  ;;  %v1440_v59 = vrot.slane %v1415_v19, %v1439_v56 }
 0x66a   :  { %1830 = vmatprep.subr.bf16.mxu1 %v2612_v61  ;;  %2432 = vmatprep.subr.bf16.mxu0 %v2713_v43 }
 0x66d   :  { %1831 = vmatpush1.bf16.msra.mxu1 %v2610_v62  ;;  %2433 = vmatpush3.bf16.msra.mxu0 %v2613_v63 }
 0x66e   :  { %1832 = vmatprep.subr.bf16.mxu1 %v2616_v0  ;;  %2434 = vmatprep.subr.bf16.mxu0 %v2713_v43 }
 0x671   :  { %1833 = vmatpush1.bf16.msra.mxu1 %v2614_v1  ;;  %2435 = vmatpush3.bf16.msra.mxu0 %v2617_v2 }
 0x672   :  { %1834 = vmatprep.subr.bf16.mxu1 %v2620_v3  ;;  %2436 = vmatprep.subr.bf16.mxu0 %v2713_v43 }
 0x675   :  { %1835 = vmatpush1.bf16.msra.mxu1 %v2618_v4  ;;  %2437 = vmatpush3.bf16.msra.mxu0 %v2621_v5 }
 0x676   :  { %1836 = vmatprep.subr.bf16.mxu1 %v2624_v6  ;;  %2438 = vmatprep.subr.bf16.mxu0 %v2713_v43 }
 0x679   :  { %1837 = vmatpush1.bf16.msra.mxu1 %v2622_v7  ;;  %2439 = vmatpush3.bf16.msra.mxu0 %v2625_v8 }
 0x67a   :  { %1838 = vmatprep.subr.bf16.mxu1 %v2628_v9  ;;  %2440 = vmatprep.subr.bf16.mxu0 %v2713_v43 }
 0x67d   :  { %1839 = vmatpush1.bf16.msra.mxu1 %v2626_v10  ;;  %2441 = vmatpush3.bf16.msra.mxu0 %v2629_v11 }
 0x67e   :  { %1840 = vmatprep.subr.bf16.mxu1 %v2632_v12  ;;  %2442 = vmatprep.subr.bf16.mxu0 %v2713_v43 }
 0x681   :  { %1841 = vmatpush1.bf16.msra.mxu1 %v2630_v13  ;;  %2443 = vmatpush3.bf16.msra.mxu0 %v2633_v14 }
 0x684   :  { %1859 = vmatmul.mubr.bf16.vlgmr.msra.gmra.mrb[24].mxu1 %v1350_v57  ;;  %2445 = vmatmul.mubr.bf16.vlgmr.msra.gmra.mrb[24].mxu0 %v1350_v57  ;;  %v1436_v57 = vrot.slane %v1415_v19, %v1435_v54 }
 0x737   :  { %v1774_v26 = vpop.f32.mrb[20].mxu1  ;;  %v1817_v43 = vpop.f32.mrb[20].mxu0 }
 0x738   :  { %v1775_v27 = vadd.f32 %v1774_v26, %v1420_v22  ;;  %v1818_v28 = vadd.f32 %v1817_v43, %v1428_v23  ;;  %v1776_v29 = vpop.f32.mrb[21].mxu1  ;;  %v1819_v30 = vpop.f32.mrb[21].mxu0 }
 0x739   :  { %v1777_v31 = vadd.f32 %v1776_v29, %v1424_v24  ;;  %v1820_v32 = vadd.f32 %v1819_v30, %v1432_v25  ;;  %v1778_v33 = vpop.f32.mrb[22].mxu1  ;;  %v1821_v34 = vpop.f32.mrb[22].mxu0 }
 0x73a   :  { %2634 = vtanh.f32 %v1775_v27  ;;  %v1779_v35 = vadd.f32 %v1778_v33, %v1420_v22  ;;  %v1780_v36 = vpop.f32.mrb[23].mxu1  ;;  %v1823_v37 = vpop.f32.mrb[23].mxu0  ;;  %v1822_v38 = vadd.f32 %v1821_v34, %v1428_v23 }
 0x73b   :  { %2636 = vtanh.f32 %v1818_v28  ;;  %v1781_v39 = vadd.f32 %v1780_v36, %v1424_v24  ;;  %v1824_v40 = vadd.f32 %v1823_v37, %v1432_v25 }
 0x73c   :  { %2638 = vtanh.f32 %v1777_v31 }
 0x73d   :  { %2640 = vtanh.f32 %v1820_v32 }
 0x73e   :  { %2642 = vtanh.f32 %v1779_v35 }
 0x73f   :  { %2644 = vtanh.f32 %v1822_v38 }
 0x740   :  { %2646 = vtanh.f32 %v1781_v39 }
 0x741   :  { %2648 = vtanh.f32 %v1824_v40 }
 0x744   :  { %v2635_v41 = vpop.eup %2634 }
 0x745   :  { %v2637_v42 = vpop.eup %2636 }
 0x746   :  { %v2639_v44 = vpop.eup %2638 }
 0x747   :  { %v2641_v45 = vpop.eup %2640  ;;  %v2163_v46 = vpack.c.bf16 %v2639_v44, %v2635_v41 }
 0x748   :  { %v2643_v47 = vpop.eup %2642  ;;  %v2164_v48 = vpack.c.bf16 %v2641_v45, %v2637_v42 }
 0x749   :  { %v2645_v49 = vpop.eup %2644  ;;  %1968 = vst [vmem:[#allocation5] sm:$0xff] %v2163_v46 }
 0x74a   :  { %v2647_v50 = vpop.eup %2646  ;;  %1969 = vst [vmem:[#allocation5 + $0x8] sm:$0xff] %v2164_v48 }
 0x74b   :  { %v2649_v51 = vpop.eup %2648  ;;  %v2167_v52 = vpack.c.bf16 %v2647_v50, %v2643_v47 }
 0x74c   :  { %v2168_v53 = vpack.c.bf16 %v2649_v51, %v2645_v49 }
 0x74d   :  { %1973 = vst [vmem:[#allocation5 + $0x1c] sm:$0xff] %v2167_v52 }
 0x74e   :  { %1974 = vst [vmem:[#allocation5 + $0x24] sm:$0xff] %v2168_v53 }
 0x757   :  { %v1860_v60 = vpop.f32.mrb[24].mxu1  ;;  %v1903_v61 = vpop.f32.mrb[24].mxu0 }
 0x758   :  { %v1861_v62 = vadd.f32 %v1860_v60, %v1436_v57  ;;  %v1904_v63 = vadd.f32 %v1903_v61, %v1444_v58  ;;  %v1862_v0 = vpop.f32.mrb[25].mxu1  ;;  %v2446_v1 = vpop.f32.mrb[25].mxu0 }
 0x759   :  { %v1863_v2 = vadd.f32 %v1862_v0, %v1440_v59  ;;  %v1864_v3 = vpop.f32.mrb[26].mxu1  ;;  %v1906_v4 = vpop.f32.mrb[26].mxu0 }
 0x75a   :  { %2650 = vtanh.f32 %v1861_v62  ;;  %v1865_v5 = vadd.f32 %v1864_v3, %v1436_v57  ;;  %v1907_v6 = vadd.f32 %v1906_v4, %v1444_v58  ;;  %v1866_v7 = vpop.f32.mrb[27].mxu1  ;;  %v2447_v8 = vpop.f32.mrb[27].mxu0 }
 0x75b   :  { %2652 = vtanh.f32 %v1904_v63  ;;  %v1867_v9 = vadd.f32 %v1866_v7, %v1440_v59 }
 0x75c   :  { %2654 = vtanh.f32 %v1863_v2 }
 0x75d   :  { %2656 = vtanh.f32 %v1865_v5 }
 0x75e   :  { %2658 = vtanh.f32 %v1907_v6 }
 0x75f   :  { %2660 = vtanh.f32 %v1867_v9 }
 0x764   :  { %v2651_v10 = vpop.eup %2650 }
 0x765   :  { %v2653_v11 = vpop.eup %2652 }
 0x766   :  { %v2655_v12 = vpop.eup %2654  ;;  %v2166_v13 = vpack.c.bf16 %v2653_v11, %v2653_v11 }
 0x767   :  { %v2657_v14 = vpop.eup %2656  ;;  %v2165_v15 = vpack.c.bf16 %v2655_v12, %v2651_v10 }
 0x768   :  { %v2659_v16 = vpop.eup %2658  ;;  %1972 = vst.msk [vmem:[#allocation5 + $0x18] sm:$0xf] %vm1971_vm2, %v2166_v13 }
 0x769   :  { %v2661_v17 = vpop.eup %2660  ;;  %1970 = vst [vmem:[#allocation5 + $0x10] sm:$0xff] %v2165_v15  ;;  %v2170_v18 = vpack.c.bf16 %v2659_v16, %v2659_v16 }
 0x76a   :  { %v2169_v19 = vpack.c.bf16 %v2661_v17, %v2657_v14 }
 0x76b   :  { %1976 = vst.msk [vmem:[#allocation5 + $0x34] sm:$0xf] %vm1971_vm2, %v2170_v18 }
 0x76c   :  { %1975 = vst [vmem:[#allocation5 + $0x2c] sm:$0xff] %v2169_v19 }
 0x76d   :  { %2695 = shalt.err (!%p2692_p12)
}
 0x76e   :  { %s2696_s19 = scalar_lea.hbm %s3424_s17, 896 }
 0x76f   :  { %p2697_p13 = scmp.ne.s32.totalorder %s3424_s17, %s2696_s19  ;;  %p2700_p0 = scmp.lt.u32.totalorder %s2696_s19, %s3424_s17 }
 0x771   :  { %p2702_p1 = pnand %p2700_p0, %p2697_p13 }
 0x773   :  { %2705 = shalt.err (!%p2702_p1)
}
 0x774   :  { %s2717_s21 = smov 448   ;;  %s2718_s7 = smov 28  }
 0x775   :  { %1988 = dma.vmem_to_hbm [thread:$0]  %s1983_s16, 896, %s3424_s17, [#allocation4], %s2717_s21, %s2717_s21, %s2718_s7  }
 0x776   :  { %2708 = dma.done.wait [#allocation4], 896  }
 0x777   :  { %2709 = vsyncadd [#allocation4], 4294966400 }
 0x778   :  { %1992 = vsyncpa [#allocation3], 1 }
 0x779   :  { %1993 = vsyncpa [#allocation4], 1 }

</bundles_post_ra>
